<compile_context>
chip_gen: v7x
topology: tpu7x:2x2x1
jax: 0.10.0
libtpu: 0.0.40
codegen_flags: <defaults>
</compile_context>

<pallas_src>
import functools

import jax
import jax.numpy as jnp
from jax.experimental import pallas as pl
from jax.experimental.pallas import tpu as pltpu


def _fused_convT_block(xm_ref, xh_ref, xwm_ref, xwh_ref, w_ref, width):
    """Fused stride-2 ConvTranspose2d for one (batch, row-tile) block.

    xm_ref  : (1, TH*W, Cin)  input rows of this tile, flattened k = i*W + j
    xh_ref  : (1, W,    Cin)  halo = first row of the next tile (zeroed in-kernel on the
                              image's last tile, i.e. the zero padding below the image)
    xwm_ref : (1, TH*W, Cin)  column-shifted input x[i, j+1] (0 at j == W-1)
    xwh_ref : (1, W,    Cin)  halo row of the column-shifted input
    w_ref   : (4*Cin, 4*Cout) fused (shift, parity) weight (zero-padded blocks)
    returns : (TH*W, 4*Cout)  float32; columns = [p(0,0) | p(0,1) | p(1,0) | p(1,1)]*Cout
    """
    W = width
    x = xm_ref[0]
    xw = xwm_ref[0]

    # Zero the halo on the image's last row-tile (transposed-conv bottom padding).
    not_last = pl.program_id(1) < pl.num_programs(1) - 1
    hx = jnp.where(not_last, xh_ref[0], jnp.zeros_like(xh_ref[0]))
    hxw = jnp.where(not_last, xwh_ref[0], jnp.zeros_like(xwh_ref[0]))

    if x.shape[0] == W:
        # single-row tile: the whole row shift comes from the halo
        x_h, x_hw = hx, hxw
    else:
        # tile-aligned sublane concat (W is a multiple of 8): x[i+1, j], x[i+1, j+1]
        x_h = jnp.concatenate([x[W:, :], hx], axis=0)
        x_hw = jnp.concatenate([xw[W:, :], hxw], axis=0)

    # Concatenate the 4 shifted views on the K axis -> one MXU matmul, lane-dense output.
    xcat = jnp.concatenate([x, xw, x_h, x_hw], axis=-1)          # (TH*W, 4*Cin)
    return jnp.dot(xcat, w_ref[...], preferred_element_type=jnp.float32)


def _stats_kernel(xm_ref, xh_ref, xwm_ref, xwh_ref, w_ref, stats_ref, *, width):
    # Pass 1: per-(n, tile) partial per-channel sum / sum-of-squares of the conv output
    # (without the conv bias -- it cancels exactly under training-mode BatchNorm).
    y0 = _fused_convT_block(xm_ref, xh_ref, xwm_ref, xwh_ref, w_ref, width)
    stats_ref[0, 0, 0:1, :] = jnp.sum(y0, axis=0, keepdims=True)
    stats_ref[0, 0, 1:2, :] = jnp.sum(y0 * y0, axis=0, keepdims=True)


def _conv_bn_relu_kernel(xm_ref, xh_ref, xwm_ref, xwh_ref, w_ref,
                         scale_ref, shift_ref, o_ref, *, width):
    # Pass 2: recompute the cheap conv, fuse BN (affine) + ReLU, write one lane-dense
    # (TH*W, 4*Cout) parity block.
    y0 = _fused_convT_block(xm_ref, xh_ref, xwm_ref, xwh_ref, w_ref, width)
    z = y0 * scale_ref[...] + shift_ref[...]
    o_ref[0] = jnp.maximum(z, 0.0).astype(o_ref.dtype)


def _pick_tile_rows(H, W, Cin, Cout, in_itemsize, target_bytes=2 << 20):
    """Rows-per-tile so the per-block VMEM footprint stays ~target (fits v7x 64MiB VMEM
    with double-buffering and leaves plenty of pipeline steps)."""
    per_row = W * (4 * Cin * in_itemsize          # x + x_w blocks (double-buffered)
                   + 8 * Cin * in_itemsize        # in-kernel shifted views + K-concat
                   + 3 * 4 * Cout * 4)            # f32 result + output block x2 buffers
    th = int(max(1, min(H, target_bytes // max(per_row, 1))))
    while H % th:                                 # keep tiles uniform (divisor of H)
        th -= 1
    return th


def upsampler_block_forward(x_nchw, weight, bias, gamma, beta, eps=1e-3,
                            compute_dtype=jnp.bfloat16, tile_rows=None):
    """Forward of UpsamplerBlock: ConvTranspose2d(3, s=2, p=1, op=1) + BN(train) + ReLU.

    Note: the ConvTranspose2d bias shifts the conv output and its batch mean equally, so
    it cancels exactly inside training-mode BatchNorm; it only affects the (untracked)
    running statistics, never this forward output.
    """
    N, Cin, H, W = x_nchw.shape
    Cout = weight.shape[1]
    assert W % 8 == 0, "kernel tiling assumes the image width is a multiple of 8"
    cdt = jnp.dtype(compute_dtype)

    # ---- layout glue (XLA): NCHW -> channels-last + ONE column-shifted copy ----
    xl = jnp.transpose(x_nchw, (0, 2, 3, 1)).astype(cdt)               # (N, H, W, Cin)
    zcol = jnp.zeros((N, H, 1, Cin), cdt)
    xwl = jnp.concatenate([xl[:, :, 1:, :], zcol], axis=2)             # x[i, j+1]
    xf = xl.reshape(N, H * W, Cin)
    xwf = xwl.reshape(N, H * W, Cin)

    # ---- fused (shift, parity) weight: (4*Cin, 4*Cout) ----
    # rows: which shifted input; cols: which output parity (row_par, col_par).
    Wt = jnp.transpose(weight, (2, 3, 0, 1)).astype(jnp.float32)       # (3,3,Cin,Cout)
    Z = jnp.zeros((Cin, Cout), jnp.float32)
    wfused = jnp.block([
        [Wt[1, 1], Wt[1, 2], Wt[2, 1], Wt[2, 2]],   # x[i,   j  ]
        [Z,        Wt[1, 0], Z,        Wt[2, 0]],   # x[i,   j+1]
        [Z,        Z,        Wt[0, 1], Wt[0, 2]],   # x[i+1, j  ]
        [Z,        Z,        Z,        Wt[0, 0]],   # x[i+1, j+1]
    ]).astype(cdt)

    TH = tile_rows if tile_rows is not None else _pick_tile_rows(H, W, Cin, Cout, cdt.itemsize)
    assert H % TH == 0, "tile_rows must divide H"
    n_tiles = H // TH
    grid = (N, n_tiles)

    main_idx = lambda n, t: (n, t, 0)
    halo_idx = lambda n, t: (n, jnp.minimum((t + 1) * TH, H - 1), 0)   # first row of next tile
    x_specs = [
        pl.BlockSpec((1, TH * W, Cin), main_idx),    # x rows of this tile
        pl.BlockSpec((1, W, Cin), halo_idx),         # x halo row
        pl.BlockSpec((1, TH * W, Cin), main_idx),    # column-shifted x
        pl.BlockSpec((1, W, Cin), halo_idx),         # its halo row
    ]
    w_spec = pl.BlockSpec((4 * Cin, 4 * Cout), lambda n, t: (0, 0))
    cparams = pltpu.CompilerParams(
        dimension_semantics=("parallel", "parallel"),
        vmem_limit_bytes=32 * 1024 * 1024)

    # ---- pass 1: stats only (the conv intermediate never hits HBM) ----
    stats = pl.pallas_call(
        functools.partial(_stats_kernel, width=W),
        out_shape=jax.ShapeDtypeStruct((N, n_tiles, 2, 4 * Cout), jnp.float32),
        grid=grid,
        in_specs=x_specs + [w_spec],
        out_specs=pl.BlockSpec((1, 1, 2, 4 * Cout), lambda n, t: (n, t, 0, 0)),
        compiler_params=cparams,
    )(xf, xf, xwf, xwf, wfused)

    # ---- BatchNorm (training-mode, biased variance) coefficients in f32 ----
    tot = jnp.sum(stats, axis=(0, 1)).reshape(2, 4, Cout).sum(axis=1)  # (2, Cout)
    count = float(N * 4 * H * W)                                       # N * 2H * 2W
    mean0 = tot[0] / count
    var = jnp.maximum(tot[1] / count - mean0 * mean0, 0.0)
    inv_std = 1.0 / jnp.sqrt(var + eps)
    scale = gamma.astype(jnp.float32) * inv_std
    shift = beta.astype(jnp.float32) - mean0 * scale   # conv bias cancels (see docstring)
    scale4 = jnp.tile(scale, 4).reshape(1, 4 * Cout)
    shift4 = jnp.tile(shift, 4).reshape(1, 4 * Cout)
    # TODO(synk): running_mean/running_var momentum updates (training side effect) are
    # not reproduced; they do not affect this forward output.

    # ---- pass 2: conv recompute + BN + ReLU fused, lane-dense (HW, 4*Cout) output ----
    vec_spec = pl.BlockSpec((1, 4 * Cout), lambda n, t: (0, 0))
    y = pl.pallas_call(
        functools.partial(_conv_bn_relu_kernel, width=W),
        out_shape=jax.ShapeDtypeStruct((N, H * W, 4 * Cout), jnp.float32),
        grid=grid,
        in_specs=x_specs + [w_spec, vec_spec, vec_spec],
        out_specs=pl.BlockSpec((1, TH * W, 4 * Cout), main_idx),
        compiler_params=cparams,
    )(xf, xf, xwf, xwf, wfused, scale4, shift4)

    # ---- layout glue (XLA): interleave the 4 parities and return NCHW ----
    y = y.reshape(N, H, W, 2, 2, Cout)                 # (n, i, j, row_par, col_par, c)
    y = jnp.transpose(y, (0, 5, 1, 3, 2, 4))           # (n, c, i, row_par, j, col_par)
    return y.reshape(N, Cout, 2 * H, 2 * W)


def _reference(x, weight, bias, gamma, beta, eps=1e-3):
    # Direct translation of PyTorch ConvTranspose2d + training-mode BN + ReLU (NCHW).
    N, Cin, H, W = x.shape
    Cout = weight.shape[1]
    ypad = jnp.zeros((N, Cout, 2 * H + 2, 2 * W + 2), jnp.float32)
    for kh in range(3):
        for kw in range(3):
            contrib = jnp.einsum('nihw,io->nohw', x, weight[:, :, kh, kw],
                                 precision=jax.lax.Precision.HIGHEST)
            ypad = ypad.at[:, :, kh:kh + 2 * H:2, kw:kw + 2 * W:2].add(contrib)
    conv = ypad[:, :, 1:2 * H + 1, 1:2 * W + 1] + bias.reshape(1, Cout, 1, 1)
    mean = conv.mean(axis=(0, 2, 3), keepdims=True)
    var = conv.var(axis=(0, 2, 3), keepdims=True)  # biased, as PyTorch BN training
    bn = ((conv - mean) / jnp.sqrt(var + eps) * gamma.reshape(1, Cout, 1, 1)
          + beta.reshape(1, Cout, 1, 1))
    return jnp.maximum(bn, 0.0)


if __name__ == "__main__":
    key = jax.random.PRNGKey(0)
    k1, k2, k3, k4, k5 = jax.random.split(key, 5)

    N, Cin, Cout, H, W = 2, 4, 8, 16, 16
    weight = 0.1 * jax.random.normal(k1, (Cin, Cout, 3, 3), jnp.float32)  # PyTorch ConvT layout
    bias = 0.1 * jax.random.normal(k2, (Cout,), jnp.float32)
    gamma = 1.0 + 0.1 * jax.random.normal(k3, (Cout,), jnp.float32)
    beta = 0.1 * jax.random.normal(k4, (Cout,), jnp.float32)
    x = jax.random.normal(k5, (N, Cin, H, W), jnp.float32)

    ref = jax.block_until_ready(_reference(x, weight, bias, gamma, beta))

    fwd = jax.jit(upsampler_block_forward,
                  static_argnames=("compute_dtype", "tile_rows"))

    # f32 compute path, single spatial tile per image (tight check).
    out_f32 = jax.block_until_ready(
        fwd(x, weight, bias, gamma, beta, compute_dtype=jnp.float32))
    assert out_f32.shape == (N, Cout, 2 * H, 2 * W), out_f32.shape
    assert jnp.allclose(out_f32, ref, atol=1e-2, rtol=1e-2), \
        float(jnp.max(jnp.abs(out_f32 - ref)))

    # f32 compute path with forced spatial tiling (exercises the halo BlockSpecs).
    out_tiled = jax.block_until_ready(
        fwd(x, weight, bias, gamma, beta, compute_dtype=jnp.float32, tile_rows=8))
    assert jnp.allclose(out_tiled, ref, atol=1e-2, rtol=1e-2), \
        float(jnp.max(jnp.abs(out_tiled - ref)))

    # Default bf16 MXU path (f32 accumulation/BN); looser tolerance for bf16 rounding.
    out_bf16 = jax.block_until_ready(fwd(x, weight, bias, gamma, beta))
    assert out_bf16.shape == (N, Cout, 2 * H, 2 * W), out_bf16.shape
    assert jnp.allclose(out_bf16, ref, atol=5e-2, rtol=5e-2), \
        float(jnp.max(jnp.abs(out_bf16 - ref)))

    print("KERNEL_OK")
</pallas_src>

<mosaic_0001>
module attributes {stable_mosaic.version = 11 : i64} {
  func.func @_stats_kernel(%arg0: i32, %arg1: i32, %arg2: memref<1x256x4xf32, #tpu.memory_space<vmem>>, %arg3: memref<1x16x4xf32, #tpu.memory_space<vmem>>, %arg4: memref<1x256x4xf32, #tpu.memory_space<vmem>>, %arg5: memref<1x16x4xf32, #tpu.memory_space<vmem>>, %arg6: memref<16x32xf32, #tpu.memory_space<vmem>>, %arg7: memref<1x1x2x32xf32, #tpu.memory_space<vmem>>) attributes {dimension_semantics = [#tpu.dimension_semantics<parallel>, #tpu.dimension_semantics<parallel>], iteration_bounds = array<i64: 2, 1>, scalar_prefetch = 0 : i64, scratch_operands = 0 : i64, tpu.core_type = #tpu.core_type<tc>, window_params = [{transform_indices = @transform_0, window_bounds = array<i64: 1, 256, 4>}, {transform_indices = @transform_1, window_bounds = array<i64: 1, 16, 4>}, {transform_indices = @transform_2, window_bounds = array<i64: 1, 256, 4>}, {transform_indices = @transform_3, window_bounds = array<i64: 1, 16, 4>}, {pipeline_mode = #tpu.pipeline_mode<synchronous>, transform_indices = @transform_4, window_bounds = array<i64: 16, 32>}, {transform_indices = @transform_5, window_bounds = array<i64: 1, 1, 2, 32>}]} {
    %c0 = arith.constant 0 : index
    %c0_0 = arith.constant 0 : index
    %c0_1 = arith.constant 0 : index
    %0 = vector.load %arg2[%c0, %c0_0, %c0_1] : memref<1x256x4xf32, #tpu.memory_space<vmem>>, vector<1x256x4xf32>
    %1 = vector.shape_cast %0 : vector<1x256x4xf32> to vector<256x4xf32>
    %c0_2 = arith.constant 0 : index
    %c0_3 = arith.constant 0 : index
    %c0_4 = arith.constant 0 : index
    %2 = vector.load %arg4[%c0_2, %c0_3, %c0_4] : memref<1x256x4xf32, #tpu.memory_space<vmem>>, vector<1x256x4xf32>
    %3 = vector.shape_cast %2 : vector<1x256x4xf32> to vector<256x4xf32>
    %c0_i32 = arith.constant 0 : i32
    %4 = arith.cmpi slt, %arg1, %c0_i32 : i32
    %c0_5 = arith.constant 0 : index
    %c0_6 = arith.constant 0 : index
    %c0_7 = arith.constant 0 : index
    %5 = vector.load %arg3[%c0_5, %c0_6, %c0_7] : memref<1x16x4xf32, #tpu.memory_space<vmem>>, vector<1x16x4xf32>
    %6 = vector.shape_cast %5 : vector<1x16x4xf32> to vector<16x4xf32>
    %cst = arith.constant 0.000000e+00 : f32
    %7 = vector.broadcast %cst : f32 to vector<16x4xf32>
    %8 = arith.select %4, %6, %7 : vector<16x4xf32>
    %c0_8 = arith.constant 0 : index
    %c0_9 = arith.constant 0 : index
    %c0_10 = arith.constant 0 : index
    %9 = vector.load %arg5[%c0_8, %c0_9, %c0_10] : memref<1x16x4xf32, #tpu.memory_space<vmem>>, vector<1x16x4xf32>
    %10 = vector.shape_cast %9 : vector<1x16x4xf32> to vector<16x4xf32>
    %cst_11 = arith.constant 0.000000e+00 : f32
    %11 = vector.broadcast %cst_11 : f32 to vector<16x4xf32>
    %12 = arith.select %4, %10, %11 : vector<16x4xf32>
    %13 = vector.extract_strided_slice %1 {offsets = [16, 0], sizes = [240, 4], strides = [1, 1]} : vector<256x4xf32> to vector<240x4xf32>
    %14 = tpu.concatenate %13, %8 in 0 : vector<240x4xf32>, vector<16x4xf32> -> vector<256x4xf32>
    %15 = vector.extract_strided_slice %3 {offsets = [16, 0], sizes = [240, 4], strides = [1, 1]} : vector<256x4xf32> to vector<240x4xf32>
    %16 = tpu.concatenate %15, %12 in 0 : vector<240x4xf32>, vector<16x4xf32> -> vector<256x4xf32>
    %17 = tpu.concatenate %1, %3, %14, %16 in 1 : vector<256x4xf32>, vector<256x4xf32>, vector<256x4xf32>, vector<256x4xf32> -> vector<256x16xf32>
    %c0_12 = arith.constant 0 : index
    %c0_13 = arith.constant 0 : index
    %18 = vector.load %arg6[%c0_12, %c0_13] : memref<16x32xf32, #tpu.memory_space<vmem>>, vector<16x32xf32>
    %cst_14 = arith.constant dense<0.000000e+00> : vector<256x32xf32>
    %19 = tpu.matmul %17, %18, %cst_14 {dimension_numbers = #tpu.dot_dimension_numbers<[1], [0], [0], [1], [0, 0, 1, 1], [], []>} : vector<256x16xf32>, vector<16x32xf32>, vector<256x32xf32> -> vector<256x32xf32>
    %cst_15 = arith.constant dense<0.000000e+00> : vector<32xf32>
    %20 = vector.multi_reduction <add>, %19, %cst_15 [0] : vector<256x32xf32> to vector<32xf32>
    %21 = vector.shape_cast %20 : vector<32xf32> to vector<1x32xf32>
    %c0_16 = arith.constant 0 : index
    %c0_17 = arith.constant 0 : index
    %c0_18 = arith.constant 0 : index
    %c0_19 = arith.constant 0 : index
    %22 = vector.load %arg7[%c0_16, %c0_17, %c0_18, %c0_19] : memref<1x1x2x32xf32, #tpu.memory_space<vmem>>, vector<1x1x1x32xf32>
    %23 = vector.shape_cast %22 : vector<1x1x1x32xf32> to vector<1x32xf32>
    %24 = vector.shape_cast %21 : vector<1x32xf32> to vector<1x1x1x32xf32>
    tpu.vector_store %arg7[%c0_16, %c0_17, %c0_18, %c0_19], %24 {strides = array<i32>} : memref<1x1x2x32xf32, #tpu.memory_space<vmem>>, vector<1x1x1x32xf32>,
    %25 = arith.mulf %19, %19 : vector<256x32xf32>
    %cst_20 = arith.constant dense<0.000000e+00> : vector<32xf32>
    %26 = vector.multi_reduction <add>, %25, %cst_20 [0] : vector<256x32xf32> to vector<32xf32>
    %27 = vector.shape_cast %26 : vector<32xf32> to vector<1x32xf32>
    %c0_21 = arith.constant 0 : index
    %c0_22 = arith.constant 0 : index
    %c1 = arith.constant 1 : index
    %c0_23 = arith.constant 0 : index
    %28 = vector.load %arg7[%c0_21, %c0_22, %c1, %c0_23] : memref<1x1x2x32xf32, #tpu.memory_space<vmem>>, vector<1x1x1x32xf32>
    %29 = vector.shape_cast %28 : vector<1x1x1x32xf32> to vector<1x32xf32>
    %30 = vector.shape_cast %27 : vector<1x32xf32> to vector<1x1x1x32xf32>
    tpu.vector_store %arg7[%c0_21, %c0_22, %c1, %c0_23], %30 {strides = array<i32>} : memref<1x1x2x32xf32, #tpu.memory_space<vmem>>, vector<1x1x1x32xf32>,
    return
  }
  func.func @transform_0(%arg0: i32, %arg1: i32) -> (i32, i32, i32) {
    %c0_i32 = arith.constant 0 : i32
    %c0_i32_0 = arith.constant 0 : i32
    return %arg0, %arg1, %c0_i32 : i32, i32, i32
  }
  func.func @transform_1(%arg0: i32, %arg1: i32) -> (i32, i32, i32) {
    %c1_i32 = arith.constant 1 : i32
    %0 = arith.addi %arg1, %c1_i32 : i32
    %c16_i32 = arith.constant 16 : i32
    %1 = arith.muli %0, %c16_i32 : i32
    %c15_i32 = arith.constant 15 : i32
    %2 = arith.minsi %1, %c15_i32 : i32
    %c0_i32 = arith.constant 0 : i32
    %c0_i32_0 = arith.constant 0 : i32
    return %arg0, %2, %c0_i32 : i32, i32, i32
  }
  func.func @transform_2(%arg0: i32, %arg1: i32) -> (i32, i32, i32) {
    %c0_i32 = arith.constant 0 : i32
    %c0_i32_0 = arith.constant 0 : i32
    return %arg0, %arg1, %c0_i32 : i32, i32, i32
  }
  func.func @transform_3(%arg0: i32, %arg1: i32) -> (i32, i32, i32) {
    %c1_i32 = arith.constant 1 : i32
    %0 = arith.addi %arg1, %c1_i32 : i32
    %c16_i32 = arith.constant 16 : i32
    %1 = arith.muli %0, %c16_i32 : i32
    %c15_i32 = arith.constant 15 : i32
    %2 = arith.minsi %1, %c15_i32 : i32
    %c0_i32 = arith.constant 0 : i32
    %c0_i32_0 = arith.constant 0 : i32
    return %arg0, %2, %c0_i32 : i32, i32, i32
  }
  func.func @transform_4(%arg0: i32, %arg1: i32) -> (i32, i32) {
    %c0_i32 = arith.constant 0 : i32
    %c0_i32_0 = arith.constant 0 : i32
    %c0_i32_1 = arith.constant 0 : i32
    return %c0_i32, %c0_i32_0 : i32, i32
  }
  func.func @transform_5(%arg0: i32, %arg1: i32) -> (i32, i32, i32, i32) {
    %c0_i32 = arith.constant 0 : i32
    %c0_i32_0 = arith.constant 0 : i32
    %c0_i32_1 = arith.constant 0 : i32
    return %arg0, %arg1, %c0_i32, %c0_i32_0 : i32, i32, i32, i32
  }
}

module attributes {stable_mosaic.version = 11 : i64} {
  func.func @_conv_bn_relu_kernel(%arg0: i32, %arg1: i32, %arg2: memref<1x256x4xf32, #tpu.memory_space<vmem>>, %arg3: memref<1x16x4xf32, #tpu.memory_space<vmem>>, %arg4: memref<1x256x4xf32, #tpu.memory_space<vmem>>, %arg5: memref<1x16x4xf32, #tpu.memory_space<vmem>>, %arg6: memref<16x32xf32, #tpu.memory_space<vmem>>, %arg7: memref<1x32xf32, #tpu.memory_space<vmem>>, %arg8: memref<1x32xf32, #tpu.memory_space<vmem>>, %arg9: memref<1x256x32xf32, #tpu.memory_space<vmem>>) attributes {dimension_semantics = [#tpu.dimension_semantics<parallel>, #tpu.dimension_semantics<parallel>], iteration_bounds = array<i64: 2, 1>, scalar_prefetch = 0 : i64, scratch_operands = 0 : i64, tpu.core_type = #tpu.core_type<tc>, window_params = [{transform_indices = @transform_0, window_bounds = array<i64: 1, 256, 4>}, {transform_indices = @transform_1, window_bounds = array<i64: 1, 16, 4>}, {transform_indices = @transform_2, window_bounds = array<i64: 1, 256, 4>}, {transform_indices = @transform_3, window_bounds = array<i64: 1, 16, 4>}, {pipeline_mode = #tpu.pipeline_mode<synchronous>, transform_indices = @transform_4, window_bounds = array<i64: 16, 32>}, {pipeline_mode = #tpu.pipeline_mode<synchronous>, transform_indices = @transform_5, window_bounds = array<i64: 1, 32>}, {pipeline_mode = #tpu.pipeline_mode<synchronous>, transform_indices = @transform_6, window_bounds = array<i64: 1, 32>}, {transform_indices = @transform_7, window_bounds = array<i64: 1, 256, 32>}]} {
    %c0 = arith.constant 0 : index
    %c0_0 = arith.constant 0 : index
    %c0_1 = arith.constant 0 : index
    %0 = vector.load %arg2[%c0, %c0_0, %c0_1] : memref<1x256x4xf32, #tpu.memory_space<vmem>>, vector<1x256x4xf32>
    %1 = vector.shape_cast %0 : vector<1x256x4xf32> to vector<256x4xf32>
    %c0_2 = arith.constant 0 : index
    %c0_3 = arith.constant 0 : index
    %c0_4 = arith.constant 0 : index
    %2 = vector.load %arg4[%c0_2, %c0_3, %c0_4] : memref<1x256x4xf32, #tpu.memory_space<vmem>>, vector<1x256x4xf32>
    %3 = vector.shape_cast %2 : vector<1x256x4xf32> to vector<256x4xf32>
    %c0_i32 = arith.constant 0 : i32
    %4 = arith.cmpi slt, %arg1, %c0_i32 : i32
    %c0_5 = arith.constant 0 : index
    %c0_6 = arith.constant 0 : index
    %c0_7 = arith.constant 0 : index
    %5 = vector.load %arg3[%c0_5, %c0_6, %c0_7] : memref<1x16x4xf32, #tpu.memory_space<vmem>>, vector<1x16x4xf32>
    %6 = vector.shape_cast %5 : vector<1x16x4xf32> to vector<16x4xf32>
    %cst = arith.constant 0.000000e+00 : f32
    %7 = vector.broadcast %cst : f32 to vector<16x4xf32>
    %8 = arith.select %4, %6, %7 : vector<16x4xf32>
    %c0_8 = arith.constant 0 : index
    %c0_9 = arith.constant 0 : index
    %c0_10 = arith.constant 0 : index
    %9 = vector.load %arg5[%c0_8, %c0_9, %c0_10] : memref<1x16x4xf32, #tpu.memory_space<vmem>>, vector<1x16x4xf32>
    %10 = vector.shape_cast %9 : vector<1x16x4xf32> to vector<16x4xf32>
    %cst_11 = arith.constant 0.000000e+00 : f32
    %11 = vector.broadcast %cst_11 : f32 to vector<16x4xf32>
    %12 = arith.select %4, %10, %11 : vector<16x4xf32>
    %13 = vector.extract_strided_slice %1 {offsets = [16, 0], sizes = [240, 4], strides = [1, 1]} : vector<256x4xf32> to vector<240x4xf32>
    %14 = tpu.concatenate %13, %8 in 0 : vector<240x4xf32>, vector<16x4xf32> -> vector<256x4xf32>
    %15 = vector.extract_strided_slice %3 {offsets = [16, 0], sizes = [240, 4], strides = [1, 1]} : vector<256x4xf32> to vector<240x4xf32>
    %16 = tpu.concatenate %15, %12 in 0 : vector<240x4xf32>, vector<16x4xf32> -> vector<256x4xf32>
    %17 = tpu.concatenate %1, %3, %14, %16 in 1 : vector<256x4xf32>, vector<256x4xf32>, vector<256x4xf32>, vector<256x4xf32> -> vector<256x16xf32>
    %c0_12 = arith.constant 0 : index
    %c0_13 = arith.constant 0 : index
    %18 = vector.load %arg6[%c0_12, %c0_13] : memref<16x32xf32, #tpu.memory_space<vmem>>, vector<16x32xf32>
    %cst_14 = arith.constant dense<0.000000e+00> : vector<256x32xf32>
    %19 = tpu.matmul %17, %18, %cst_14 {dimension_numbers = #tpu.dot_dimension_numbers<[1], [0], [0], [1], [0, 0, 1, 1], [], []>} : vector<256x16xf32>, vector<16x32xf32>, vector<256x32xf32> -> vector<256x32xf32>
    %c0_15 = arith.constant 0 : index
    %c0_16 = arith.constant 0 : index
    %20 = vector.load %arg7[%c0_15, %c0_16] : memref<1x32xf32, #tpu.memory_space<vmem>>, vector<1x32xf32>
    %21 = vector.broadcast %20 : vector<1x32xf32> to vector<256x32xf32>
    %22 = arith.mulf %19, %21 : vector<256x32xf32>
    %c0_17 = arith.constant 0 : index
    %c0_18 = arith.constant 0 : index
    %23 = vector.load %arg8[%c0_17, %c0_18] : memref<1x32xf32, #tpu.memory_space<vmem>>, vector<1x32xf32>
    %24 = vector.broadcast %23 : vector<1x32xf32> to vector<256x32xf32>
    %25 = arith.addf %22, %24 : vector<256x32xf32>
    %cst_19 = arith.constant 0.000000e+00 : f32
    %26 = vector.broadcast %cst_19 : f32 to vector<256x32xf32>
    %27 = arith.maximumf %25, %26 : vector<256x32xf32>
    %c0_20 = arith.constant 0 : index
    %c0_21 = arith.constant 0 : index
    %c0_22 = arith.constant 0 : index
    %28 = vector.load %arg9[%c0_20, %c0_21, %c0_22] : memref<1x256x32xf32, #tpu.memory_space<vmem>>, vector<1x256x32xf32>
    %29 = vector.shape_cast %28 : vector<1x256x32xf32> to vector<256x32xf32>
    %30 = vector.shape_cast %27 : vector<256x32xf32> to vector<1x256x32xf32>
    tpu.vector_store %arg9[%c0_20, %c0_21, %c0_22], %30 {strides = array<i32>} : memref<1x256x32xf32, #tpu.memory_space<vmem>>, vector<1x256x32xf32>,
    return
  }
  func.func @transform_0(%arg0: i32, %arg1: i32) -> (i32, i32, i32) {
    %c0_i32 = arith.constant 0 : i32
    %c0_i32_0 = arith.constant 0 : i32
    return %arg0, %arg1, %c0_i32 : i32, i32, i32
  }
  func.func @transform_1(%arg0: i32, %arg1: i32) -> (i32, i32, i32) {
    %c1_i32 = arith.constant 1 : i32
    %0 = arith.addi %arg1, %c1_i32 : i32
    %c16_i32 = arith.constant 16 : i32
    %1 = arith.muli %0, %c16_i32 : i32
    %c15_i32 = arith.constant 15 : i32
    %2 = arith.minsi %1, %c15_i32 : i32
    %c0_i32 = arith.constant 0 : i32
    %c0_i32_0 = arith.constant 0 : i32
    return %arg0, %2, %c0_i32 : i32, i32, i32
  }
  func.func @transform_2(%arg0: i32, %arg1: i32) -> (i32, i32, i32) {
    %c0_i32 = arith.constant 0 : i32
    %c0_i32_0 = arith.constant 0 : i32
    return %arg0, %arg1, %c0_i32 : i32, i32, i32
  }
  func.func @transform_3(%arg0: i32, %arg1: i32) -> (i32, i32, i32) {
    %c1_i32 = arith.constant 1 : i32
    %0 = arith.addi %arg1, %c1_i32 : i32
    %c16_i32 = arith.constant 16 : i32
    %1 = arith.muli %0, %c16_i32 : i32
    %c15_i32 = arith.constant 15 : i32
    %2 = arith.minsi %1, %c15_i32 : i32
    %c0_i32 = arith.constant 0 : i32
    %c0_i32_0 = arith.constant 0 : i32
    return %arg0, %2, %c0_i32 : i32, i32, i32
  }
  func.func @transform_4(%arg0: i32, %arg1: i32) -> (i32, i32) {
    %c0_i32 = arith.constant 0 : i32
    %c0_i32_0 = arith.constant 0 : i32
    %c0_i32_1 = arith.constant 0 : i32
    return %c0_i32, %c0_i32_0 : i32, i32
  }
  func.func @transform_5(%arg0: i32, %arg1: i32) -> (i32, i32) {
    %c0_i32 = arith.constant 0 : i32
    %c0_i32_0 = arith.constant 0 : i32
    %c0_i32_1 = arith.constant 0 : i32
    return %c0_i32, %c0_i32_0 : i32, i32
  }
  func.func @transform_6(%arg0: i32, %arg1: i32) -> (i32, i32) {
    %c0_i32 = arith.constant 0 : i32
    %c0_i32_0 = arith.constant 0 : i32
    %c0_i32_1 = arith.constant 0 : i32
    return %c0_i32, %c0_i32_0 : i32, i32
  }
  func.func @transform_7(%arg0: i32, %arg1: i32) -> (i32, i32, i32) {
    %c0_i32 = arith.constant 0 : i32
    %c0_i32_0 = arith.constant 0 : i32
    return %arg0, %arg1, %c0_i32 : i32, i32, i32
  }
}

</mosaic_0001>

<bundles_post_ra>
// kernel: tile.18
= control target key start
LH: loop header
LB: loop body
LE: loop exit
PB: predicated region body
PF: predicated region fallthrough
CT: control target
= control target key end

     0   :  { %s22_s0 = inlined_call_operand.vmem [shape: f32[8], index: 0, kind: input, shape index: {}]   ;;  %s23_s1 = inlined_call_operand.vmem [shape: f32[4,8], index: 1, kind: output, shape index: {}]  }
   0x1   :  { %v4_v0 = vld [vmem:[%s22_s0] ss:$0 sm:$0xff] }
   0x2   :  { %5 = vst [vmem:[%s23_s1] sm:$0xf] %v4_v0 }

// kernel: tile.19
= control target key start
LH: loop header
LB: loop body
LE: loop exit
PB: predicated region body
PF: predicated region fallthrough
CT: control target
= control target key end

     0   :  { %vm7_vm0 = vcmask 64512   ;;  %s37_s8 = smov 8   ;;  %s38_s9 = smov 16   ;;  %vm13_vm1 = vcmask 261312   ;;  %vm19_vm2 = vcmask 195712   ;;  %vm25_vm3 = vcmask 130112   ;;  %s55_s0 = inlined_call_operand.vmem [shape: f32[4,8], index: 0, kind: input, shape index: {}]   ;;  %s56_s1 = inlined_call_operand.vmem [shape: f32[1,32], index: 1, kind: output, shape index: {}]  }
   0x1   :  { %v4_v0 = vld [vmem:[%s55_s0] sm:$0xf]  ;;  %s36_s0 = smov 24  }
   0x2   :  { %5 = vst [vmem:[#allocation1] sm:$0xf] %v4_v0 }
   0x9   :  { %v10_v1 = vld [vmem:[#allocation1 + $0x3] sm:$0x1]   ;;  %v22_v2 = vld [vmem:[#allocation1 + $0x1] sm:$0x1]   ;;  %v6_v3 = vld [vmem:[#allocation1] sm:$0x1]  }
   0xa   :  { %11 = vrot.lane.b32.xlu0 %v10_v1, %s36_s0  ;;  %23 = vrot.lane.b32.xlu1 %v22_v2, %s37_s8  ;;  %v16_v4 = vld [vmem:[#allocation1 + $0x2] sm:$0x1]   ;;  %8 = vst.msk [vmem:[#allocation0] sm:$0x1] %vm7_vm0, %v6_v3  }
   0xe   :  { %17 = vrot.lane.b32.xlu0 %v16_v4, %s38_s9 }
  0x7c   :  { %v12_v5 = vpop.permute.xlu0 %11   ;;  %v24_v6 = vpop.permute.xlu1 %23  }
  0x7d   :  { %14 = vst.msk [vmem:[#allocation0] sm:$0x1] %vm13_vm1, %v12_v5  }
  0x80   :  { %v18_v7 = vpop.permute.xlu0 %17  }
  0x81   :  { %20 = vst.msk [vmem:[#allocation0] sm:$0x1] %vm19_vm2, %v18_v7  }
  0x82   :  { %26 = vst.msk [vmem:[#allocation0] sm:$0x1] %vm25_vm3, %v24_v6  }
  0x89   :  { %v30_v8 = vld [vmem:[#allocation0] sm:$0x1] }
  0x8a   :  { %32 = vst [vmem:[%s56_s1] sm:$0x1] %v30_v8 }

// kernel: upsampler_block_forward.2
= control target key start
LH: loop header
LB: loop body
LE: loop exit
PB: predicated region body
PF: predicated region fallthrough
CT: control target
= control target key end

     0   :  { %s1823_s18 = smov 0   ;;  %s1825_s19 = smov 0   ;;  %s2343_s0 = inlined_call_operand.vmem [shape: f32[2,256,4], index: 0, kind: input, shape index: {}, may-alias: {0,1}]   ;;  %s2344_s1 = inlined_call_operand.vmem [shape: f32[2,256,4], index: 1, kind: input, shape index: {}, may-alias: {0,1}]   ;;  %s2345_s2 = inlined_call_operand.vmem [shape: f32[2,256,4], index: 2, kind: input, shape index: {}, may-alias: {2,3}]   ;;  %s2346_s3 = inlined_call_operand.vmem [shape: f32[2,256,4], index: 3, kind: input, shape index: {}, may-alias: {2,3}]   ;;  %s2347_s4 = inlined_call_operand.vmem [shape: f32[16,32], index: 4, kind: input, shape index: {}]   ;;  %s2348_s5 = inlined_call_operand.vmem [shape: f32[2,1,2,32], index: 5, kind: output, shape index: {}]  }
   0x1   :  { %s1827_s20 = smov 0  }
   0x2 LB: > { %s27_s1 = sadd.s32 1, %s1783_s19  ;;  %p1585_p0 = scmp.ge.s32.totalorder %s1787_s20, 1  ;;  %s1787_s20 = sphi %s1827_s20, %s15_s20   ;;  %s1783_s19 = sphi %s1825_s19, %s2350_s19   ;;  %s1779_s18 = sphi %s1823_s18, %s2349_s18  }
   0x3   : > { %p29_p1 = scmp.ge.s32.totalorder %s27_s1, 2  ;;  %p291_p2 = scmp.lt.s32.totalorder %s1787_s20, 3 }
   0x5   : > { %s2352_s1 = smov (%p29_p1, %s27_s1), 0  ;;  %p292_p3 = pnand %p1585_p0, %p291_p2 }
   0x6   : > { %p361_p4 = scmp.lt.s32.totalorder (!%p292_p3), %s1779_s18, 1  ;;  %v952_v0 = vld [vmem:[%s2347_s4] sm:$0xff] (!%p292_p3)  ;;  %v953_v1 = vld [vmem:[%s2347_s4 + $0x8] sm:$0xff] (!%p292_p3)  ;;  %s1789_s6 = smov (!%p292_p3), 4   ;;  %vm853_vm0 = vcmask (!%p292_p3), 31744   ;;  %vm886_vm1 = vcmask (!%p292_p3), 64512  }
   0x7   : > { %295 = sbr.rel (%p292_p3) target bundleno = 555 (0x22b), region = 40  ;;  %v1721_v2 = vpack.c.bf16 (!%p292_p3), %v953_v1, %v952_v0  ;;  %s1790_s7 = smov (!%p292_p3), 8   ;;  %vm919_vm2 = vcmask (!%p292_p3), 97280   ;;  %vm954_vm3 = vcmask (!%p292_p3), 130048   ;;  %vm1276_vm4 = vcmask (!%p292_p3), 261120  }
   0x8   : > { %s1791_s8 = smov (!%p292_p3), 12   ;;  %vm1346_vm5 = vcmask (!%p292_p3), 253952  }
   0x9   : > { %1722 = vmatprep.subr.bf16.mxu0 (!%p292_p3), %v1721_v2  ;;  %1725 = vmatprep.subr.bf16.mxu1 (!%p292_p3), %v1721_v2 }
   0xa   : > { %1724 = vmatpush3.bf16.msra.mxu0 (!%p292_p3), %v1721_v2  ;;  %1726 = vmatpush3.bf16.msra.mxu1 (!%p292_p3), %v1721_v2 }
   0xe   : > { %s2354_s18 = smov (!%p361_p4, %s1779_s18), 1 }
   0xf   : > { %s1629_s24 = sshll.u32 %s2354_s18, 8  ;;  %s1594_s9 = sshll.u32 %s2354_s18, 1 }
  0x10   : > { %s1853_s27 = scalar_lea.vmem %s2345_s2, %s1629_s24  ;;  %s1858_s30 = scalar_lea.vmem %s2343_s0, %s1629_s24 }
  0x11   : > { %v455_v3 = vld [vmem:[%s1853_s27] sm:$0xff]  ;;  %v1862_v4 = vld [vmem:[%s1858_s30 + $0x10] sm:$0xff]  ;;  %v456_v5 = vld [vmem:[%s1853_s27 + $0x8] sm:$0xff]  ;;  %s422_s12 = scalar_lea.vmem %s2348_s5, %s1594_s9 }
  0x12   : > { %531 = vrot.lane.b32.xlu0 %v455_v3, %s1789_s6  ;;  %659 = vrot.lane.b32.xlu1 %v1862_v4, %s1790_s7  ;;  %v1869_v6 = vld [vmem:[%s1858_s30 + $0x18] sm:$0xff]  ;;  %v457_v7 = vld [vmem:[%s1853_s27 + $0x10] sm:$0xff] }
  0x13   : > { %v458_v8 = vld [vmem:[%s1853_s27 + $0x18] sm:$0xff]  ;;  %v1881_v9 = vld [vmem:[%s1858_s30 + $0x20] sm:$0xff]  ;;  %v1884_v10 = vld [vmem:[%s1858_s30 + $0x28] sm:$0xff] }
  0x14   : > { %v459_v11 = vld [vmem:[%s1853_s27 + $0x20] sm:$0xff]  ;;  %v460_v12 = vld [vmem:[%s1853_s27 + $0x28] sm:$0xff]  ;;  %v1897_v13 = vld [vmem:[%s1858_s30 + $0x30] sm:$0xff] }
  0x15   : > { %v1900_v14 = vld [vmem:[%s1858_s30 + $0x38] sm:$0xff]  ;;  %v461_v15 = vld [vmem:[%s1853_s27 + $0x30] sm:$0xff]  ;;  %v1913_v17 = vld [vmem:[%s1858_s30 + $0x40] sm:$0xff] }
  0x16   : > { %533 = vrot.lane.b32.xlu0 %v456_v5, %s1789_s6  ;;  %661 = vrot.lane.b32.xlu1 %v1869_v6, %s1790_s7  ;;  %v462_v16 = vld [vmem:[%s1853_s27 + $0x38] sm:$0xff]  ;;  %v1916_v18 = vld [vmem:[%s1858_s30 + $0x48] sm:$0xff] }
  0x17   : > { %v463_v19 = vld [vmem:[%s1853_s27 + $0x40] sm:$0xff]  ;;  %v464_v20 = vld [vmem:[%s1853_s27 + $0x48] sm:$0xff]  ;;  %v1929_v21 = vld [vmem:[%s1858_s30 + $0x50] sm:$0xff] }
  0x18   : > { %v1932_v22 = vld [vmem:[%s1858_s30 + $0x58] sm:$0xff]  ;;  %v465_v23 = vld [vmem:[%s1853_s27 + $0x50] sm:$0xff]  ;;  %v1945_v25 = vld [vmem:[%s1858_s30 + $0x60] sm:$0xff] }
  0x19   : > { %v466_v24 = vld [vmem:[%s1853_s27 + $0x58] sm:$0xff]  ;;  %v1948_v26 = vld [vmem:[%s1858_s30 + $0x68] sm:$0xff]  ;;  %v467_v27 = vld [vmem:[%s1853_s27 + $0x60] sm:$0xff] }
  0x1a   : > { %757 = vrot.lane.b32.xlu0 %v457_v7, %s1791_s8  ;;  %759 = vrot.lane.b32.xlu1 %v458_v8, %s1791_s8  ;;  %v468_v28 = vld [vmem:[%s1853_s27 + $0x68] sm:$0xff]  ;;  %v1961_v29 = vld [vmem:[%s1858_s30 + $0x70] sm:$0xff] }
  0x1b   : > { %v1964_v30 = vld [vmem:[%s1858_s30 + $0x78] sm:$0xff]  ;;  %v469_v31 = vld [vmem:[%s1853_s27 + $0x70] sm:$0xff]  ;;  %v1977_v33 = vld [vmem:[%s1858_s30 + $0x80] sm:$0xff] }
  0x1c   : > { %v470_v32 = vld [vmem:[%s1853_s27 + $0x78] sm:$0xff]  ;;  %v1980_v34 = vld [vmem:[%s1858_s30 + $0x88] sm:$0xff]  ;;  %v471_v35 = vld [vmem:[%s1853_s27 + $0x80] sm:$0xff] }
  0x1d   : > { %v472_v36 = vld [vmem:[%s1853_s27 + $0x88] sm:$0xff]  ;;  %v1993_v37 = vld [vmem:[%s1858_s30 + $0x90] sm:$0xff]  ;;  %v1996_v38 = vld [vmem:[%s1858_s30 + $0x98] sm:$0xff] }
  0x1e   : > { %535 = vrot.lane.b32.xlu0 %v457_v7, %s1789_s6  ;;  %537 = vrot.lane.b32.xlu1 %v458_v8, %s1789_s6  ;;  %v473_v39 = vld [vmem:[%s1853_s27 + $0x90] sm:$0xff]  ;;  %v474_v40 = vld [vmem:[%s1853_s27 + $0x98] sm:$0xff] }
  0x1f   : > { %v2009_v41 = vld [vmem:[%s1858_s30 + $0xa0] sm:$0xff]  ;;  %v2012_v42 = vld [vmem:[%s1858_s30 + $0xa8] sm:$0xff]  ;;  %v2029_v53 = vld [vmem:[%s1858_s30 + $0xb0] sm:$0xff] }
  0x20   : > { %v475_v43 = vld [vmem:[%s1853_s27 + $0xa0] sm:$0xff]  ;;  %v476_v44 = vld [vmem:[%s1853_s27 + $0xa8] sm:$0xff]  ;;  %v2032_v54 = vld [vmem:[%s1858_s30 + $0xb8] sm:$0xff] }
  0x21   : > { %v423_v47 = vld [vmem:[%s1858_s30] sm:$0xff]  ;;  %v424_v48 = vld [vmem:[%s1858_s30 + $0x8] sm:$0xff]  ;;  %v477_v61 = vld [vmem:[%s1853_s27 + $0xb0] sm:$0xff] }
  0x22   : > { %663 = vrot.lane.b32.xlu0 %v1881_v9, %s1790_s7  ;;  %665 = vrot.lane.b32.xlu1 %v1884_v10, %s1790_s7  ;;  %v478_v62 = vld [vmem:[%s1853_s27 + $0xb8] sm:$0xff]  ;;  %v2055_v7 = vld [vmem:[%s1858_s30 + $0xc0] sm:$0xff] }
  0x23   : > { %v2058_v8 = vld [vmem:[%s1858_s30 + $0xc8] sm:$0xff] }
  0x26   : > { %761 = vrot.lane.b32.xlu0 %v459_v11, %s1791_s8  ;;  %763 = vrot.lane.b32.xlu1 %v460_v12, %s1791_s8 }
  0x2a   : > { %539 = vrot.lane.b32.xlu0 %v459_v11, %s1789_s6  ;;  %541 = vrot.lane.b32.xlu1 %v460_v12, %s1789_s6 }
  0x2e   : > { %667 = vrot.lane.b32.xlu0 %v1897_v13, %s1790_s7  ;;  %669 = vrot.lane.b32.xlu1 %v1900_v14, %s1790_s7 }
  0x32   : > { %765 = vrot.lane.b32.xlu0 %v461_v15, %s1791_s8  ;;  %767 = vrot.lane.b32.xlu1 %v462_v16, %s1791_s8 }
  0x36   : > { %543 = vrot.lane.b32.xlu0 %v461_v15, %s1789_s6  ;;  %545 = vrot.lane.b32.xlu1 %v462_v16, %s1789_s6 }
  0x3a   : > { %671 = vrot.lane.b32.xlu0 %v1913_v17, %s1790_s7  ;;  %673 = vrot.lane.b32.xlu1 %v1916_v18, %s1790_s7 }
  0x3e   : > { %769 = vrot.lane.b32.xlu0 %v463_v19, %s1791_s8  ;;  %771 = vrot.lane.b32.xlu1 %v464_v20, %s1791_s8 }
  0x42   : > { %547 = vrot.lane.b32.xlu0 %v463_v19, %s1789_s6  ;;  %549 = vrot.lane.b32.xlu1 %v464_v20, %s1789_s6 }
  0x46   : > { %675 = vrot.lane.b32.xlu0 %v1929_v21, %s1790_s7  ;;  %677 = vrot.lane.b32.xlu1 %v1932_v22, %s1790_s7 }
  0x4a   : > { %773 = vrot.lane.b32.xlu0 %v465_v23, %s1791_s8  ;;  %775 = vrot.lane.b32.xlu1 %v466_v24, %s1791_s8 }
  0x4e   : > { %551 = vrot.lane.b32.xlu0 %v465_v23, %s1789_s6  ;;  %553 = vrot.lane.b32.xlu1 %v466_v24, %s1789_s6 }
  0x52   : > { %679 = vrot.lane.b32.xlu0 %v1945_v25, %s1790_s7  ;;  %681 = vrot.lane.b32.xlu1 %v1948_v26, %s1790_s7 }
  0x56   : > { %777 = vrot.lane.b32.xlu0 %v467_v27, %s1791_s8  ;;  %779 = vrot.lane.b32.xlu1 %v468_v28, %s1791_s8 }
  0x5a   : > { %555 = vrot.lane.b32.xlu0 %v467_v27, %s1789_s6  ;;  %557 = vrot.lane.b32.xlu1 %v468_v28, %s1789_s6 }
  0x5e   : > { %683 = vrot.lane.b32.xlu0 %v1961_v29, %s1790_s7  ;;  %685 = vrot.lane.b32.xlu1 %v1964_v30, %s1790_s7 }
  0x62   : > { %781 = vrot.lane.b32.xlu0 %v469_v31, %s1791_s8  ;;  %783 = vrot.lane.b32.xlu1 %v470_v32, %s1791_s8 }
  0x66   : > { %559 = vrot.lane.b32.xlu0 %v469_v31, %s1789_s6  ;;  %561 = vrot.lane.b32.xlu1 %v470_v32, %s1789_s6 }
  0x6a   : > { %687 = vrot.lane.b32.xlu0 %v1977_v33, %s1790_s7  ;;  %689 = vrot.lane.b32.xlu1 %v1980_v34, %s1790_s7 }
  0x6e   : > { %785 = vrot.lane.b32.xlu0 %v471_v35, %s1791_s8  ;;  %787 = vrot.lane.b32.xlu1 %v472_v36, %s1791_s8 }
  0x72   : > { %563 = vrot.lane.b32.xlu0 %v471_v35, %s1789_s6  ;;  %565 = vrot.lane.b32.xlu1 %v472_v36, %s1789_s6  ;;  %v2081_v35 = vld [vmem:[%s1858_s30 + $0xd0] sm:$0xff]  ;;  %v2084_v36 = vld [vmem:[%s1858_s30 + $0xd8] sm:$0xff] }
  0x76   : > { %691 = vrot.lane.b32.xlu0 %v1993_v37, %s1790_s7  ;;  %693 = vrot.lane.b32.xlu1 %v1996_v38, %s1790_s7 }
  0x7a   : > { %789 = vrot.lane.b32.xlu0 %v473_v39, %s1791_s8  ;;  %791 = vrot.lane.b32.xlu1 %v474_v40, %s1791_s8 }
  0x7e   : > { %567 = vrot.lane.b32.xlu0 %v473_v39, %s1789_s6  ;;  %569 = vrot.lane.b32.xlu1 %v474_v40, %s1789_s6 }
  0x82   : > { %695 = vrot.lane.b32.xlu0 %v2009_v41, %s1790_s7  ;;  %697 = vrot.lane.b32.xlu1 %v2012_v42, %s1790_s7 }
  0x84   : > { %v532_v45 = vpop.permute.xlu0 %531  ;;  %v660_v46 = vpop.permute.xlu1 %659 }
  0x85   : > { %v854_v51 = vsel %vm853_vm0, %v423_v47, %v532_v45 }
  0x86   : > { %793 = vrot.lane.b32.xlu0 %v475_v43, %s1791_s8  ;;  %795 = vrot.lane.b32.xlu1 %v476_v44, %s1791_s8  ;;  %v887_v55 = vsel %vm886_vm1, %v854_v51, %v660_v46 }
  0x88   : > { %v534_v49 = vpop.permute.xlu0 %533  ;;  %v662_v50 = vpop.permute.xlu1 %661 }
  0x89   : > { %v855_v52 = vsel %vm853_vm0, %v424_v48, %v534_v49 }
  0x8a   : > { %571 = vrot.lane.b32.xlu0 %v475_v43, %s1789_s6  ;;  %573 = vrot.lane.b32.xlu1 %v476_v44, %s1789_s6  ;;  %v888_v56 = vsel %vm886_vm1, %v855_v52, %v662_v50 }
  0x8c   : > { %v758_v57 = vpop.permute.xlu0 %757  ;;  %v760_v58 = vpop.permute.xlu1 %759 }
  0x8d   : > { %v921_v59 = vsel %vm919_vm2, %v888_v56, %v760_v58  ;;  %v920_v60 = vsel %vm919_vm2, %v887_v55, %v758_v57  ;;  %v2107_v55 = vld [vmem:[%s1858_s30 + $0xe0] sm:$0xff]  ;;  %v2110_v56 = vld [vmem:[%s1858_s30 + $0xe8] sm:$0xff] }
  0x8e   : > { %699 = vrot.lane.b32.xlu0 %v2029_v53, %s1790_s7  ;;  %701 = vrot.lane.b32.xlu1 %v2032_v54, %s1790_s7 }
  0x8f   : > { %1673 = vmatprep.mubr.msk.f32.mxu0 %vm954_vm3, %v920_v60 }
  0x90   : > { %1674 = vmatmul.mubr.msk.f32.vlgmr.msra.gmra.mrb[0].mxu0 %vm954_vm3, %v921_v59  ;;  %v536_v63 = vpop.permute.xlu0 %535  ;;  %v538_v0 = vpop.permute.xlu1 %537 }
  0x91   : > { %v856_v3 = vsel %vm853_vm0, %v1862_v4, %v536_v63  ;;  %v857_v5 = vsel %vm853_vm0, %v1869_v6, %v538_v0  ;;  %v479_v4 = vld [vmem:[%s1853_s27 + $0xc0] sm:$0xff]  ;;  %v480_v6 = vld [vmem:[%s1853_s27 + $0xc8] sm:$0xff] }
  0x92   : > { %797 = vrot.lane.b32.xlu0 %v477_v61, %s1791_s8  ;;  %799 = vrot.lane.b32.xlu1 %v478_v62, %s1791_s8 }
  0x94   : > { %v664_v1 = vpop.permute.xlu0 %663  ;;  %v666_v2 = vpop.permute.xlu1 %665 }
  0x95   : > { %v889_v11 = vsel %vm886_vm1, %v856_v3, %v664_v1  ;;  %v890_v12 = vsel %vm886_vm1, %v857_v5, %v666_v2 }
  0x96   : > { %575 = vrot.lane.b32.xlu0 %v477_v61, %s1789_s6  ;;  %577 = vrot.lane.b32.xlu1 %v478_v62, %s1789_s6 }
  0x98   : > { %v762_v15 = vpop.permute.xlu0 %761  ;;  %v764_v16 = vpop.permute.xlu1 %763 }
  0x99   : > { %v922_v19 = vsel %vm919_vm2, %v889_v11, %v762_v15  ;;  %v923_v20 = vsel %vm919_vm2, %v890_v12, %v764_v16  ;;  %v2133_v11 = vld [vmem:[%s1858_s30 + $0xf0] sm:$0xff]  ;;  %v2136_v12 = vld [vmem:[%s1858_s30 + $0xf8] sm:$0xff] }
  0x9a   : > { %703 = vrot.lane.b32.xlu0 %v2055_v7, %s1790_s7  ;;  %705 = vrot.lane.b32.xlu1 %v2058_v8, %s1790_s7 }
  0x9b   : > { %1676 = vmatprep.mubr.msk.f32.mxu0 %vm954_vm3, %v922_v19 }
  0x9c   : > { %1677 = vmatmul.mubr.msk.f32.gmra.mrb[2].mxu0 %vm954_vm3, %v923_v20  ;;  %v540_v23 = vpop.permute.xlu0 %539  ;;  %v542_v24 = vpop.permute.xlu1 %541 }
  0x9d   : > { %v858_v31 = vsel %vm853_vm0, %v1881_v9, %v540_v23  ;;  %v859_v32 = vsel %vm853_vm0, %v1884_v10, %v542_v24  ;;  %v481_v9 = vld [vmem:[%s1853_s27 + $0xd0] sm:$0xff]  ;;  %v482_v10 = vld [vmem:[%s1853_s27 + $0xd8] sm:$0xff] }
  0x9e   : > { %801 = vrot.lane.b32.xlu0 %v479_v4, %s1791_s8  ;;  %803 = vrot.lane.b32.xlu1 %v480_v6, %s1791_s8 }
  0xa0   : > { %v668_v27 = vpop.permute.xlu0 %667  ;;  %v670_v28 = vpop.permute.xlu1 %669 }
  0xa1   : > { %v891_v39 = vsel %vm886_vm1, %v858_v31, %v668_v27  ;;  %v892_v40 = vsel %vm886_vm1, %v859_v32, %v670_v28 }
  0xa2   : > { %579 = vrot.lane.b32.xlu0 %v479_v4, %s1789_s6  ;;  %581 = vrot.lane.b32.xlu1 %v480_v6, %s1789_s6 }
  0xa4   : > { %v766_v43 = vpop.permute.xlu0 %765  ;;  %v768_v44 = vpop.permute.xlu1 %767 }
  0xa5   : > { %v924_v45 = vsel %vm919_vm2, %v891_v39, %v766_v43  ;;  %v925_v46 = vsel %vm919_vm2, %v892_v40, %v768_v44 }
  0xa6   : > { %707 = vrot.lane.b32.xlu0 %v2081_v35, %s1790_s7  ;;  %709 = vrot.lane.b32.xlu1 %v2084_v36, %s1790_s7 }
  0xa7   : > { %1679 = vmatprep.mubr.msk.f32.mxu0 %vm954_vm3, %v924_v45 }
  0xa8   : > { %1680 = vmatmul.mubr.msk.f32.gmra.mrb[4].mxu0 %vm954_vm3, %v925_v46  ;;  %v544_v47 = vpop.permute.xlu0 %543  ;;  %v546_v48 = vpop.permute.xlu1 %545 }
  0xa9   : > { %v860_v51 = vsel %vm853_vm0, %v1897_v13, %v544_v47  ;;  %v861_v52 = vsel %vm853_vm0, %v1900_v14, %v546_v48  ;;  %v483_v13 = vld [vmem:[%s1853_s27 + $0xe0] sm:$0xff]  ;;  %v484_v14 = vld [vmem:[%s1853_s27 + $0xe8] sm:$0xff] }
  0xaa   : > { %805 = vrot.lane.b32.xlu0 %v481_v9, %s1791_s8  ;;  %807 = vrot.lane.b32.xlu1 %v482_v10, %s1791_s8 }
  0xac   : > { %v672_v49 = vpop.permute.xlu0 %671  ;;  %v674_v50 = vpop.permute.xlu1 %673 }
  0xad   : > { %v893_v57 = vsel %vm886_vm1, %v860_v51, %v672_v49  ;;  %v894_v58 = vsel %vm886_vm1, %v861_v52, %v674_v50 }
  0xae   : > { %583 = vrot.lane.b32.xlu0 %v481_v9, %s1789_s6  ;;  %585 = vrot.lane.b32.xlu1 %v482_v10, %s1789_s6  ;;  %v1792_v9 = vmov 0.0  }
  0xb0   : > { %v770_v59 = vpop.permute.xlu0 %769  ;;  %v772_v60 = vpop.permute.xlu1 %771 }
  0xb1   : > { %v926_v61 = vsel %vm919_vm2, %v893_v57, %v770_v59  ;;  %v927_v62 = vsel %vm919_vm2, %v894_v58, %v772_v60 }
  0xb2   : > { %711 = vrot.lane.b32.xlu0 %v2107_v55, %s1790_s7  ;;  %713 = vrot.lane.b32.xlu1 %v2110_v56, %s1790_s7 }
  0xb3   : > { %1682 = vmatprep.mubr.msk.f32.mxu0 %vm954_vm3, %v926_v61 }
  0xb4   : > { %1683 = vmatmul.mubr.msk.f32.gmra.mrb[6].mxu0 %vm954_vm3, %v927_v62  ;;  %v548_v63 = vpop.permute.xlu0 %547  ;;  %v550_v0 = vpop.permute.xlu1 %549 }
  0xb5   : > { %v862_v3 = vsel %vm853_vm0, %v1913_v17, %v548_v63  ;;  %v863_v5 = vsel %vm853_vm0, %v1916_v18, %v550_v0  ;;  %v485_v17 = vld [vmem:[%s1853_s27 + $0xf0] sm:$0xff]  ;;  %v486_v18 = vld [vmem:[%s1853_s27 + $0xf8] sm:$0xff] }
  0xb6   : > { %809 = vrot.lane.b32.xlu0 %v483_v13, %s1791_s8  ;;  %811 = vrot.lane.b32.xlu1 %v484_v14, %s1791_s8 }
  0xb8   : > { %v676_v1 = vpop.permute.xlu0 %675  ;;  %v678_v2 = vpop.permute.xlu1 %677 }
  0xb9   : > { %v895_v15 = vsel %vm886_vm1, %v862_v3, %v676_v1  ;;  %v896_v16 = vsel %vm886_vm1, %v863_v5, %v678_v2 }
  0xba   : > { %587 = vrot.lane.b32.xlu0 %v483_v13, %s1789_s6  ;;  %589 = vrot.lane.b32.xlu1 %v484_v14, %s1789_s6 }
  0xbc   : > { %v774_v19 = vpop.permute.xlu0 %773  ;;  %v776_v20 = vpop.permute.xlu1 %775 }
  0xbd   : > { %v928_v4 = vsel %vm919_vm2, %v895_v15, %v774_v19  ;;  %v929_v6 = vsel %vm919_vm2, %v896_v16, %v776_v20 }
  0xbe   : > { %715 = vrot.lane.b32.xlu0 %v2133_v11, %s1790_s7  ;;  %717 = vrot.lane.b32.xlu1 %v2136_v12, %s1790_s7 }
  0xbf   : > { %1685 = vmatprep.mubr.msk.f32.mxu0 %vm954_vm3, %v928_v4 }
  0xc0   : > { %1686 = vmatmul.mubr.msk.f32.gmra.mrb[8].mxu0 %vm954_vm3, %v929_v6  ;;  %v552_v23 = vpop.permute.xlu0 %551  ;;  %v554_v24 = vpop.permute.xlu1 %553 }
  0xc1   : > { %v864_v31 = vsel %vm853_vm0, %v1929_v21, %v552_v23  ;;  %v865_v32 = vsel %vm853_vm0, %v1932_v22, %v554_v24 }
  0xc2   : > { %813 = vrot.lane.b32.xlu0 %v485_v17, %s1791_s8  ;;  %815 = vrot.lane.b32.xlu1 %v486_v18, %s1791_s8 }
  0xc4   : > { %v680_v27 = vpop.permute.xlu0 %679  ;;  %v682_v28 = vpop.permute.xlu1 %681 }
  0xc5   : > { %v897_v39 = vsel %vm886_vm1, %v864_v31, %v680_v27  ;;  %v898_v40 = vsel %vm886_vm1, %v865_v32, %v682_v28 }
  0xc6   : > { %591 = vrot.lane.b32.xlu0 %v485_v17, %s1789_s6  ;;  %593 = vrot.lane.b32.xlu1 %v486_v18, %s1789_s6 }
  0xc8   : > { %v778_v43 = vpop.permute.xlu0 %777  ;;  %v780_v44 = vpop.permute.xlu1 %779 }
  0xc9   : > { %v930_v45 = vsel %vm919_vm2, %v897_v39, %v778_v43  ;;  %v931_v46 = vsel %vm919_vm2, %v898_v40, %v780_v44 }
  0xca   : > { %1756 = vrot.lane.b32.xlu0 %v1792_v9, %s1790_s7  ;;  %1688 = vmatprep.mubr.msk.f32.mxu0 %vm954_vm3, %v930_v45 }
  0xcb   : > { %1761 = vrot.lane.b32.xlu1 %v1792_v9, %s1791_s8  ;;  %1689 = vmatmul.mubr.msk.f32.gmra.mrb[10].mxu0 %vm954_vm3, %v931_v46 }
  0xcc   : > { %v556_v21 = vpop.permute.xlu0 %555  ;;  %v558_v22 = vpop.permute.xlu1 %557 }
  0xcd   : > { %v866_v48 = vsel %vm853_vm0, %v1945_v25, %v556_v21  ;;  %v867_v49 = vsel %vm853_vm0, %v1948_v26, %v558_v22 }
  0xd0   : > { %v684_v10 = vpop.permute.xlu0 %683  ;;  %v686_v47 = vpop.permute.xlu1 %685 }
  0xd1   : > { %v899_v50 = vsel %vm886_vm1, %v866_v48, %v684_v10  ;;  %v900_v51 = vsel %vm886_vm1, %v867_v49, %v686_v47 }
  0xd4   : > { %v782_v52 = vpop.permute.xlu0 %781  ;;  %v784_v57 = vpop.permute.xlu1 %783 }
  0xd5   : > { %v932_v58 = vsel %vm919_vm2, %v899_v50, %v782_v52  ;;  %v933_v59 = vsel %vm919_vm2, %v900_v51, %v784_v57 }
  0xd6   : > { %1691 = vmatprep.mubr.msk.f32.mxu0 %vm954_vm3, %v932_v58 }
  0xd7   : > { %1692 = vmatmul.mubr.msk.f32.gmra.mrb[12].mxu0 %vm954_vm3, %v933_v59 }
  0xd8   : > { %v560_v60 = vpop.permute.xlu0 %559  ;;  %v562_v61 = vpop.permute.xlu1 %561 }
  0xd9   : > { %v868_v26 = vsel %vm853_vm0, %v1961_v29, %v560_v60  ;;  %v869_v13 = vsel %vm853_vm0, %v1964_v30, %v562_v61 }
  0xdc   : > { %v688_v25 = vpop.permute.xlu0 %687  ;;  %v690_v62 = vpop.permute.xlu1 %689 }
  0xdd   : > { %v901_v14 = vsel %vm886_vm1, %v868_v26, %v688_v25  ;;  %v902_v63 = vsel %vm886_vm1, %v869_v13, %v690_v62 }
  0xe0   : > { %v786_v0 = vpop.permute.xlu0 %785  ;;  %v788_v1 = vpop.permute.xlu1 %787 }
  0xe1   : > { %v934_v2 = vsel %vm919_vm2, %v901_v14, %v786_v0  ;;  %v935_v3 = vsel %vm919_vm2, %v902_v63, %v788_v1 }
  0xe2   : > { %1694 = vmatprep.mubr.msk.f32.mxu0 %vm954_vm3, %v934_v2 }
  0xe3   : > { %1695 = vmatmul.mubr.msk.f32.gmra.mrb[14].mxu0 %vm954_vm3, %v935_v3 }
  0xe4   : > { %v564_v5 = vpop.permute.xlu0 %563  ;;  %v566_v15 = vpop.permute.xlu1 %565 }
  0xe5   : > { %v870_v30 = vsel %vm853_vm0, %v1977_v33, %v564_v5  ;;  %v871_v19 = vsel %vm853_vm0, %v1980_v34, %v566_v15 }
  0xe8   : > { %v692_v29 = vpop.permute.xlu0 %691  ;;  %v694_v16 = vpop.permute.xlu1 %693 }
  0xe9   : > { %v903_v20 = vsel %vm886_vm1, %v870_v30, %v692_v29  ;;  %v904_v4 = vsel %vm886_vm1, %v871_v19, %v694_v16 }
  0xec   : > { %v790_v6 = vpop.permute.xlu0 %789  ;;  %v792_v17 = vpop.permute.xlu1 %791 }
  0xed   : > { %v937_v18 = vsel %vm919_vm2, %v904_v4, %v792_v17  ;;  %v936_v23 = vsel %vm919_vm2, %v903_v20, %v790_v6 }
  0xee   : > { %1697 = vmatprep.mubr.msk.f32.mxu1 %vm954_vm3, %v936_v23 }
  0xef   : > { %1698 = vmatmul.mubr.msk.f32.vlgmr.msra.gmra.mrb[0].mxu1 %vm954_vm3, %v937_v18 }
  0xf0   : > { %v568_v24 = vpop.permute.xlu0 %567  ;;  %v570_v27 = vpop.permute.xlu1 %569 }
  0xf1   : > { %v872_v34 = vsel %vm853_vm0, %v1993_v37, %v568_v24  ;;  %v873_v31 = vsel %vm853_vm0, %v1996_v38, %v570_v27 }
  0xf4   : > { %v696_v33 = vpop.permute.xlu0 %695  ;;  %v698_v28 = vpop.permute.xlu1 %697 }
  0xf5   : > { %v905_v32 = vsel %vm886_vm1, %v872_v34, %v696_v33  ;;  %v906_v39 = vsel %vm886_vm1, %v873_v31, %v698_v28 }
  0xf8   : > { %v794_v40 = vpop.permute.xlu0 %793  ;;  %v796_v43 = vpop.permute.xlu1 %795 }
  0xf9   : > { %v938_v44 = vsel %vm919_vm2, %v905_v32, %v794_v40  ;;  %v939_v45 = vsel %vm919_vm2, %v906_v39, %v796_v43 }
  0xfa   : > { %1700 = vmatprep.mubr.msk.f32.mxu1 %vm954_vm3, %v938_v44 }
  0xfb   : > { %1701 = vmatmul.mubr.msk.f32.gmra.mrb[2].mxu1 %vm954_vm3, %v939_v45 }
  0xfc   : > { %v572_v46 = vpop.permute.xlu0 %571  ;;  %v574_v9 = vpop.permute.xlu1 %573 }
  0xfd   : > { %v874_v38 = vsel %vm853_vm0, %v2009_v41, %v572_v46  ;;  %v875_v22 = vsel %vm853_vm0, %v2012_v42, %v574_v9 }
 0x100   : > { %v700_v37 = vpop.permute.xlu0 %699  ;;  %v702_v21 = vpop.permute.xlu1 %701 }
 0x101   : > { %v907_v10 = vsel %vm886_vm1, %v874_v38, %v700_v37  ;;  %v908_v47 = vsel %vm886_vm1, %v875_v22, %v702_v21 }
 0x104   : > { %v798_v48 = vpop.permute.xlu0 %797  ;;  %v800_v49 = vpop.permute.xlu1 %799 }
 0x105   : > { %v940_v50 = vsel %vm919_vm2, %v907_v10, %v798_v48  ;;  %v941_v51 = vsel %vm919_vm2, %v908_v47, %v800_v49 }
 0x106   : > { %1703 = vmatprep.mubr.msk.f32.mxu1 %vm954_vm3, %v940_v50 }
 0x107   : > { %1704 = vmatmul.mubr.msk.f32.gmra.mrb[4].mxu1 %vm954_vm3, %v941_v51 }
 0x108   : > { %v576_v52 = vpop.permute.xlu0 %575  ;;  %v578_v57 = vpop.permute.xlu1 %577 }
 0x109   : > { %v876_v42 = vsel %vm853_vm0, %v2029_v53, %v576_v52  ;;  %v877_v59 = vsel %vm853_vm0, %v2032_v54, %v578_v57 }
 0x10c   : > { %v704_v41 = vpop.permute.xlu0 %703  ;;  %v706_v58 = vpop.permute.xlu1 %705 }
 0x10d   : > { %v909_v60 = vsel %vm886_vm1, %v876_v42, %v704_v41  ;;  %v910_v61 = vsel %vm886_vm1, %v877_v59, %v706_v58 }
 0x110   : > { %v802_v25 = vpop.permute.xlu0 %801  ;;  %v804_v62 = vpop.permute.xlu1 %803 }
 0x111   : > { %v942_v26 = vsel %vm919_vm2, %v909_v60, %v802_v25  ;;  %v943_v13 = vsel %vm919_vm2, %v910_v61, %v804_v62 }
 0x112   : > { %1706 = vmatprep.mubr.msk.f32.mxu1 %vm954_vm3, %v942_v26 }
 0x113   : > { %1707 = vmatmul.mubr.msk.f32.gmra.mrb[6].mxu1 %vm954_vm3, %v943_v13 }
 0x114   : > { %v580_v14 = vpop.permute.xlu0 %579  ;;  %v582_v63 = vpop.permute.xlu1 %581 }
 0x115   : > { %v878_v54 = vsel %vm853_vm0, %v2055_v7, %v580_v14  ;;  %v879_v1 = vsel %vm853_vm0, %v2058_v8, %v582_v63 }
 0x118   : > { %v708_v53 = vpop.permute.xlu0 %707  ;;  %v710_v0 = vpop.permute.xlu1 %709 }
 0x119   : > { %v911_v2 = vsel %vm886_vm1, %v878_v54, %v708_v53  ;;  %v912_v3 = vsel %vm886_vm1, %v879_v1, %v710_v0 }
 0x11c   : > { %v806_v5 = vpop.permute.xlu0 %805  ;;  %v808_v15 = vpop.permute.xlu1 %807 }
 0x11d   : > { %v944_v29 = vsel %vm919_vm2, %v911_v2, %v806_v5  ;;  %v945_v16 = vsel %vm919_vm2, %v912_v3, %v808_v15 }
 0x11e   : > { %1709 = vmatprep.mubr.msk.f32.mxu1 %vm954_vm3, %v944_v29 }
 0x11f   : > { %1710 = vmatmul.mubr.msk.f32.gmra.mrb[8].mxu1 %vm954_vm3, %v945_v16 }
 0x120   : > { %v584_v30 = vpop.permute.xlu0 %583  ;;  %v586_v19 = vpop.permute.xlu1 %585 }
 0x121   : > { %v880_v8 = vsel %vm853_vm0, %v2081_v35, %v584_v30  ;;  %v881_v4 = vsel %vm853_vm0, %v2084_v36, %v586_v19 }
 0x124   : > { %v712_v7 = vpop.permute.xlu0 %711  ;;  %v714_v20 = vpop.permute.xlu1 %713 }
 0x125   : > { %v913_v6 = vsel %vm886_vm1, %v880_v8, %v712_v7  ;;  %v914_v17 = vsel %vm886_vm1, %v881_v4, %v714_v20 }
 0x128   : > { %v810_v18 = vpop.permute.xlu0 %809  ;;  %v812_v23 = vpop.permute.xlu1 %811 }
 0x129   : > { %v946_v24 = vsel %vm919_vm2, %v913_v6, %v810_v18  ;;  %v947_v27 = vsel %vm919_vm2, %v914_v17, %v812_v23 }
 0x12a   : > { %1712 = vmatprep.mubr.msk.f32.mxu1 %vm954_vm3, %v946_v24 }
 0x12b   : > { %1713 = vmatmul.mubr.msk.f32.gmra.mrb[10].mxu1 %vm954_vm3, %v947_v27 }
 0x12c   : > { %v588_v33 = vpop.permute.xlu0 %587  ;;  %v590_v28 = vpop.permute.xlu1 %589 }
 0x12d   : > { %v882_v36 = vsel %vm853_vm0, %v2107_v55, %v588_v33  ;;  %v883_v31 = vsel %vm853_vm0, %v2110_v56, %v590_v28 }
 0x130   : > { %v716_v35 = vpop.permute.xlu0 %715  ;;  %v718_v34 = vpop.permute.xlu1 %717 }
 0x131   : > { %v915_v32 = vsel %vm886_vm1, %v882_v36, %v716_v35  ;;  %v916_v39 = vsel %vm886_vm1, %v883_v31, %v718_v34 }
 0x134   : > { %v814_v40 = vpop.permute.xlu0 %813  ;;  %v816_v43 = vpop.permute.xlu1 %815 }
 0x135   : > { %v948_v44 = vsel %vm919_vm2, %v915_v32, %v814_v40  ;;  %v949_v45 = vsel %vm919_vm2, %v916_v39, %v816_v43 }
 0x136   : > { %1715 = vmatprep.mubr.msk.f32.mxu1 %vm954_vm3, %v948_v44 }
 0x137   : > { %1716 = vmatmul.mubr.msk.f32.gmra.mrb[12].mxu1 %vm954_vm3, %v949_v45 }
 0x138   : > { %v592_v46 = vpop.permute.xlu0 %591  ;;  %v594_v9 = vpop.permute.xlu1 %593 }
 0x139   : > { %v884_v38 = vsel %vm853_vm0, %v2133_v11, %v592_v46  ;;  %v885_v22 = vsel %vm853_vm0, %v2136_v12, %v594_v9 }
 0x13c   : > { %v1757_v55 = vpop.permute.xlu0 %1756 }
 0x13d   : > { %v1759_v37 = vunpack.i.h.bf16 %v1757_v55  ;;  %v1758_v21 = vunpack.i.l.bf16 %v1757_v55  ;;  %v1762_v56 = vpop.permute.xlu1 %1761 }
 0x13e   : > { %v1764_v10 = vunpack.i.h.bf16 %v1762_v56  ;;  %v1763_v47 = vunpack.i.l.bf16 %v1762_v56 }
 0x13f   : > { %v917_v48 = vsel %vm886_vm1, %v884_v38, %v1758_v21  ;;  %v918_v49 = vsel %vm886_vm1, %v885_v22, %v1759_v37 }
 0x140   : > { %v950_v50 = vsel %vm919_vm2, %v917_v48, %v1763_v47  ;;  %v951_v51 = vsel %vm919_vm2, %v918_v49, %v1764_v10 }
 0x141   : > { %1718 = vmatprep.mubr.msk.f32.mxu1 %vm954_vm3, %v950_v50 }
 0x142   : > { %1719 = vmatmul.mubr.msk.f32.gmra.mrb[14].mxu1 %vm954_vm3, %v951_v51 }
 0x163   : > { %v1675_v52 = vpop.f32.mrb[0].mxu0 }
 0x164   : > { %v1278_v11 = vsel %vm1276_vm4, %v1675_v52, 0.0  ;;  %v1349_v57 = vmul.f32 %v1675_v52, %v1675_v52  ;;  %v1117_v12 = vpop.f32.mrb[1].mxu0 }
 0x165   : > { %v1277_v41 = vsel %vm1276_vm4, %v1117_v12, 0.0  ;;  %v1348_v58 = vmul.f32 %v1117_v12, %v1117_v12 }
 0x166   : > { %v1381_v42 = vsel %vm1276_vm4, %v1349_v57, 0.0  ;;  %v1279_v59 = vadd.f32 %v1278_v11, %v1277_v41 }
 0x167   : > { %v1380_v60 = vsel %vm1276_vm4, %v1348_v58, 0.0 }
 0x168   : > { %v1382_v61 = vadd.f32 %v1381_v42, %v1380_v60 }
 0x16f   : > { %v1678_v25 = vpop.f32.mrb[2].mxu0 }
 0x170   : > { %v1127_v62 = vpop.f32.mrb[3].mxu0  ;;  %v1351_v26 = vmul.f32 %v1678_v25, %v1678_v25  ;;  %v1282_v53 = vsel %vm1276_vm4, %v1678_v25, 0.0 }
 0x171   : > { %v1280_v13 = vsel %vm1276_vm4, %v1127_v62, 0.0  ;;  %v1350_v14 = vmul.f32 %v1127_v62, %v1127_v62 }
 0x172   : > { %v1281_v63 = vadd.f32 %v1280_v13, %v1279_v59  ;;  %v1385_v2 = vsel %vm1276_vm4, %v1351_v26, 0.0 }
 0x173   : > { %v1383_v0 = vsel %vm1276_vm4, %v1350_v14, 0.0 }
 0x174   : > { %v1384_v54 = vadd.f32 %v1383_v0, %v1382_v61  ;;  %v1283_v1 = vadd.f32 %v1282_v53, %v1281_v63 }
 0x176   : > { %v1386_v3 = vadd.f32 %v1385_v2, %v1384_v54 }
 0x17b   : > { %v1681_v5 = vpop.f32.mrb[4].mxu0 }
 0x17c   : > { %v1137_v15 = vpop.f32.mrb[5].mxu0  ;;  %v1353_v29 = vmul.f32 %v1681_v5, %v1681_v5  ;;  %v1286_v7 = vsel %vm1276_vm4, %v1681_v5, 0.0 }
 0x17d   : > { %v1284_v16 = vsel %vm1276_vm4, %v1137_v15, 0.0  ;;  %v1352_v30 = vmul.f32 %v1137_v15, %v1137_v15 }
 0x17e   : > { %v1285_v19 = vadd.f32 %v1284_v16, %v1283_v1  ;;  %v1389_v6 = vsel %vm1276_vm4, %v1353_v29, 0.0 }
 0x17f   : > { %v1387_v20 = vsel %vm1276_vm4, %v1352_v30, 0.0 }
 0x180   : > { %v1388_v8 = vadd.f32 %v1387_v20, %v1386_v3  ;;  %v1287_v4 = vadd.f32 %v1286_v7, %v1285_v19 }
 0x182   : > { %v1390_v17 = vadd.f32 %v1389_v6, %v1388_v8 }
 0x187   : > { %v1684_v18 = vpop.f32.mrb[6].mxu0 }
 0x188   : > { %v1147_v23 = vpop.f32.mrb[7].mxu0  ;;  %v1355_v24 = vmul.f32 %v1684_v18, %v1684_v18  ;;  %v1290_v35 = vsel %vm1276_vm4, %v1684_v18, 0.0 }
 0x189   : > { %v1288_v27 = vsel %vm1276_vm4, %v1147_v23, 0.0  ;;  %v1354_v33 = vmul.f32 %v1147_v23, %v1147_v23 }
 0x18a   : > { %v1289_v28 = vadd.f32 %v1288_v27, %v1287_v4  ;;  %v1393_v32 = vsel %vm1276_vm4, %v1355_v24, 0.0 }
 0x18b   : > { %v1391_v34 = vsel %vm1276_vm4, %v1354_v33, 0.0 }
 0x18c   : > { %v1392_v36 = vadd.f32 %v1391_v34, %v1390_v17  ;;  %v1291_v31 = vadd.f32 %v1290_v35, %v1289_v28 }
 0x18e   : > { %v1394_v39 = vadd.f32 %v1393_v32, %v1392_v36 }
 0x193   : > { %v1687_v40 = vpop.f32.mrb[8].mxu0 }
 0x194   : > { %v1157_v43 = vpop.f32.mrb[9].mxu0  ;;  %v1357_v44 = vmul.f32 %v1687_v40, %v1687_v40  ;;  %v1294_v55 = vsel %vm1276_vm4, %v1687_v40, 0.0 }
 0x195   : > { %v1292_v45 = vsel %vm1276_vm4, %v1157_v43, 0.0  ;;  %v1356_v46 = vmul.f32 %v1157_v43, %v1157_v43 }
 0x196   : > { %v1293_v9 = vadd.f32 %v1292_v45, %v1291_v31  ;;  %v1397_v38 = vsel %vm1276_vm4, %v1357_v44, 0.0 }
 0x197   : > { %v1395_v37 = vsel %vm1276_vm4, %v1356_v46, 0.0 }
 0x198   : > { %v1396_v21 = vadd.f32 %v1395_v37, %v1394_v39  ;;  %v1295_v56 = vadd.f32 %v1294_v55, %v1293_v9 }
 0x19a   : > { %v1398_v22 = vadd.f32 %v1397_v38, %v1396_v21 }
 0x19e   : > { %v1690_v10 = vpop.f32.mrb[10].mxu0 }
 0x19f   : > { %v1167_v47 = vpop.f32.mrb[11].mxu0  ;;  %v1359_v48 = vmul.f32 %v1690_v10, %v1690_v10  ;;  %v1298_v52 = vsel %vm1276_vm4, %v1690_v10, 0.0 }
 0x1a0   : > { %v1296_v49 = vsel %vm1276_vm4, %v1167_v47, 0.0  ;;  %v1358_v50 = vmul.f32 %v1167_v47, %v1167_v47 }
 0x1a1   : > { %v1297_v51 = vadd.f32 %v1296_v49, %v1295_v56  ;;  %v1401_v41 = vsel %vm1276_vm4, %v1359_v48, 0.0 }
 0x1a2   : > { %v1399_v11 = vsel %vm1276_vm4, %v1358_v50, 0.0 }
 0x1a3   : > { %v1400_v57 = vadd.f32 %v1399_v11, %v1398_v22  ;;  %v1299_v12 = vadd.f32 %v1298_v52, %v1297_v51 }
 0x1a5   : > { %v1402_v58 = vadd.f32 %v1401_v41, %v1400_v57 }
 0x1aa   : > { %v1693_v42 = vpop.f32.mrb[12].mxu0 }
 0x1ab   : > { %v1177_v59 = vpop.f32.mrb[13].mxu0  ;;  %v1361_v60 = vmul.f32 %v1693_v42, %v1693_v42  ;;  %v1302_v26 = vsel %vm1276_vm4, %v1693_v42, 0.0 }
 0x1ac   : > { %v1300_v61 = vsel %vm1276_vm4, %v1177_v59, 0.0  ;;  %v1360_v25 = vmul.f32 %v1177_v59, %v1177_v59 }
 0x1ad   : > { %v1301_v62 = vadd.f32 %v1300_v61, %v1299_v12  ;;  %v1405_v53 = vsel %vm1276_vm4, %v1361_v60, 0.0 }
 0x1ae   : > { %v1403_v13 = vsel %vm1276_vm4, %v1360_v25, 0.0 }
 0x1af   : > { %v1404_v14 = vadd.f32 %v1403_v13, %v1402_v58  ;;  %v1303_v63 = vadd.f32 %v1302_v26, %v1301_v62 }
 0x1b1   : > { %v1406_v0 = vadd.f32 %v1405_v53, %v1404_v14 }
 0x1b6   : > { %v1696_v54 = vpop.f32.mrb[14].mxu0 }
 0x1b7   : > { %v1187_v1 = vpop.f32.mrb[15].mxu0  ;;  %v1363_v2 = vmul.f32 %v1696_v54, %v1696_v54  ;;  %v1306_v29 = vsel %vm1276_vm4, %v1696_v54, 0.0 }
 0x1b8   : > { %v1304_v3 = vsel %vm1276_vm4, %v1187_v1, 0.0  ;;  %v1362_v5 = vmul.f32 %v1187_v1, %v1187_v1 }
 0x1b9   : > { %v1305_v15 = vadd.f32 %v1304_v3, %v1303_v63  ;;  %v1409_v7 = vsel %vm1276_vm4, %v1363_v2, 0.0 }
 0x1ba   : > { %v1407_v16 = vsel %vm1276_vm4, %v1362_v5, 0.0 }
 0x1bb   : > { %v1307_v30 = vadd.f32 %v1306_v29, %v1305_v15  ;;  %v1408_v19 = vadd.f32 %v1407_v16, %v1406_v0 }
 0x1bd   : > { %v1410_v20 = vadd.f32 %v1409_v7, %v1408_v19 }
 0x1c2   : > { %v1699_v8 = vpop.f32.mrb[0].mxu1 }
 0x1c3   : > { %v1197_v4 = vpop.f32.mrb[1].mxu1  ;;  %v1365_v6 = vmul.f32 %v1699_v8, %v1699_v8  ;;  %v1310_v24 = vsel %vm1276_vm4, %v1699_v8, 0.0 }
 0x1c4   : > { %v1308_v17 = vsel %vm1276_vm4, %v1197_v4, 0.0  ;;  %v1364_v18 = vmul.f32 %v1197_v4, %v1197_v4 }
 0x1c5   : > { %v1309_v23 = vadd.f32 %v1308_v17, %v1307_v30  ;;  %v1413_v35 = vsel %vm1276_vm4, %v1365_v6, 0.0 }
 0x1c6   : > { %v1411_v27 = vsel %vm1276_vm4, %v1364_v18, 0.0 }
 0x1c7   : > { %v1412_v33 = vadd.f32 %v1411_v27, %v1410_v20  ;;  %v1311_v28 = vadd.f32 %v1310_v24, %v1309_v23 }
 0x1c9   : > { %v1414_v34 = vadd.f32 %v1413_v35, %v1412_v33 }
 0x1ce   : > { %v1702_v36 = vpop.f32.mrb[2].mxu1 }
 0x1cf   : > { %v1207_v31 = vpop.f32.mrb[3].mxu1  ;;  %v1367_v32 = vmul.f32 %v1702_v36, %v1702_v36  ;;  %v1314_v44 = vsel %vm1276_vm4, %v1702_v36, 0.0 }
 0x1d0   : > { %v1312_v39 = vsel %vm1276_vm4, %v1207_v31, 0.0  ;;  %v1366_v40 = vmul.f32 %v1207_v31, %v1207_v31 }
 0x1d1   : > { %v1313_v43 = vadd.f32 %v1312_v39, %v1311_v28  ;;  %v1417_v55 = vsel %vm1276_vm4, %v1367_v32, 0.0 }
 0x1d2   : > { %v1415_v45 = vsel %vm1276_vm4, %v1366_v40, 0.0 }
 0x1d3   : > { %v1416_v46 = vadd.f32 %v1415_v45, %v1414_v34  ;;  %v1315_v9 = vadd.f32 %v1314_v44, %v1313_v43 }
 0x1d5   : > { %v1418_v37 = vadd.f32 %v1417_v55, %v1416_v46 }
 0x1da   : > { %v1705_v21 = vpop.f32.mrb[4].mxu1 }
 0x1db   : > { %v1217_v56 = vpop.f32.mrb[5].mxu1  ;;  %v1369_v38 = vmul.f32 %v1705_v21, %v1705_v21  ;;  %v1318_v48 = vsel %vm1276_vm4, %v1705_v21, 0.0 }
 0x1dc   : > { %v1316_v22 = vsel %vm1276_vm4, %v1217_v56, 0.0  ;;  %v1368_v10 = vmul.f32 %v1217_v56, %v1217_v56 }
 0x1dd   : > { %v1317_v47 = vadd.f32 %v1316_v22, %v1315_v9  ;;  %v1421_v52 = vsel %vm1276_vm4, %v1369_v38, 0.0 }
 0x1de   : > { %v1419_v49 = vsel %vm1276_vm4, %v1368_v10, 0.0 }
 0x1df   : > { %v1420_v50 = vadd.f32 %v1419_v49, %v1418_v37  ;;  %v1319_v51 = vadd.f32 %v1318_v48, %v1317_v47 }
 0x1e1   : > { %v1422_v11 = vadd.f32 %v1421_v52, %v1420_v50 }
 0x1e6   : > { %v1708_v57 = vpop.f32.mrb[6].mxu1 }
 0x1e7   : > { %v1227_v12 = vpop.f32.mrb[7].mxu1  ;;  %v1371_v41 = vmul.f32 %v1708_v57, %v1708_v57  ;;  %v1322_v60 = vsel %vm1276_vm4, %v1708_v57, 0.0 }
 0x1e8   : > { %v1320_v58 = vsel %vm1276_vm4, %v1227_v12, 0.0  ;;  %v1370_v42 = vmul.f32 %v1227_v12, %v1227_v12 }
 0x1e9   : > { %v1321_v59 = vadd.f32 %v1320_v58, %v1319_v51  ;;  %v1425_v26 = vsel %vm1276_vm4, %v1371_v41, 0.0 }
 0x1ea   : > { %v1423_v61 = vsel %vm1276_vm4, %v1370_v42, 0.0 }
 0x1eb   : > { %v1424_v25 = vadd.f32 %v1423_v61, %v1422_v11  ;;  %v1323_v62 = vadd.f32 %v1322_v60, %v1321_v59 }
 0x1ed   : > { %v1426_v13 = vadd.f32 %v1425_v26, %v1424_v25 }
 0x1f2   : > { %v1711_v14 = vpop.f32.mrb[8].mxu1 }
 0x1f3   : > { %v1237_v63 = vpop.f32.mrb[9].mxu1  ;;  %v1373_v53 = vmul.f32 %v1711_v14, %v1711_v14  ;;  %v1326_v2 = vsel %vm1276_vm4, %v1711_v14, 0.0 }
 0x1f4   : > { %v1324_v0 = vsel %vm1276_vm4, %v1237_v63, 0.0  ;;  %v1372_v54 = vmul.f32 %v1237_v63, %v1237_v63 }
 0x1f5   : > { %v1325_v1 = vadd.f32 %v1324_v0, %v1323_v62  ;;  %v1429_v29 = vsel %vm1276_vm4, %v1373_v53, 0.0 }
 0x1f6   : > { %v1427_v3 = vsel %vm1276_vm4, %v1372_v54, 0.0 }
 0x1f7   : > { %v1428_v5 = vadd.f32 %v1427_v3, %v1426_v13  ;;  %v1327_v15 = vadd.f32 %v1326_v2, %v1325_v1 }
 0x1f9   : > { %v1430_v16 = vadd.f32 %v1429_v29, %v1428_v5 }
 0x1fe   : > { %v1714_v30 = vpop.f32.mrb[10].mxu1 }
 0x1ff   : > { %v1247_v19 = vpop.f32.mrb[11].mxu1  ;;  %v1375_v7 = vmul.f32 %v1714_v30, %v1714_v30  ;;  %v1330_v6 = vsel %vm1276_vm4, %v1714_v30, 0.0 }
 0x200   : > { %v1328_v20 = vsel %vm1276_vm4, %v1247_v19, 0.0  ;;  %v1374_v8 = vmul.f32 %v1247_v19, %v1247_v19 }
 0x201   : > { %v1329_v4 = vadd.f32 %v1328_v20, %v1327_v15  ;;  %v1433_v24 = vsel %vm1276_vm4, %v1375_v7, 0.0 }
 0x202   : > { %v1431_v17 = vsel %vm1276_vm4, %v1374_v8, 0.0 }
 0x203   : > { %v1432_v18 = vadd.f32 %v1431_v17, %v1430_v16  ;;  %v1331_v23 = vadd.f32 %v1330_v6, %v1329_v4 }
 0x205   : > { %v1434_v27 = vadd.f32 %v1433_v24, %v1432_v18 }
 0x20a   : > { %v1717_v33 = vpop.f32.mrb[12].mxu1 }
 0x20b   : > { %v1257_v28 = vpop.f32.mrb[13].mxu1  ;;  %v1377_v35 = vmul.f32 %v1717_v33, %v1717_v33  ;;  %v1334_v32 = vsel %vm1276_vm4, %v1717_v33, 0.0 }
 0x20c   : > { %v1332_v34 = vsel %vm1276_vm4, %v1257_v28, 0.0  ;;  %v1376_v36 = vmul.f32 %v1257_v28, %v1257_v28 }
 0x20d   : > { %v1333_v31 = vadd.f32 %v1332_v34, %v1331_v23  ;;  %v1437_v44 = vsel %vm1276_vm4, %v1377_v35, 0.0 }
 0x20e   : > { %v1435_v39 = vsel %vm1276_vm4, %v1376_v36, 0.0 }
 0x20f   : > { %v1436_v40 = vadd.f32 %v1435_v39, %v1434_v27  ;;  %v1335_v43 = vadd.f32 %v1334_v32, %v1333_v31 }
 0x211   : > { %v1438_v45 = vadd.f32 %v1437_v44, %v1436_v40 }
 0x215   : > { %v1720_v46 = vpop.f32.mrb[14].mxu1 }
 0x216   : > { %v1267_v9 = vpop.f32.mrb[15].mxu1  ;;  %v1379_v55 = vmul.f32 %v1720_v46, %v1720_v46  ;;  %v1338_v38 = vsel %vm1276_vm4, %v1720_v46, 0.0 }
 0x217   : > { %v1336_v37 = vsel %vm1276_vm4, %v1267_v9, 0.0  ;;  %v1378_v21 = vmul.f32 %v1267_v9, %v1267_v9 }
 0x218   : > { %v1337_v56 = vadd.f32 %v1336_v37, %v1335_v43  ;;  %v1441_v48 = vsel %vm1276_vm4, %v1379_v55, 0.0 }
 0x219   : > { %v1439_v22 = vsel %vm1276_vm4, %v1378_v21, 0.0 }
 0x21a   : > { %v1339_v10 = vadd.f32 %v1338_v38, %v1337_v56  ;;  %v1440_v47 = vadd.f32 %v1439_v22, %v1438_v45 }
 0x21c   : > { %v1340_v49 = vrot.slane %v1339_v10, 4  ;;  %v1442_v50 = vadd.f32 %v1441_v48, %v1440_v47 }
 0x21e   : > { %v1341_v51 = vadd.f32 %v1340_v49, %v1339_v10  ;;  %v1443_v52 = vrot.slane %v1442_v50, 4 }
 0x220   : > { %v1342_v11 = vrot.slane %v1341_v51, 2  ;;  %v1444_v57 = vadd.f32 %v1443_v52, %v1442_v50 }
 0x222   : > { %v1343_v12 = vadd.f32 %v1342_v11, %v1341_v51  ;;  %v1445_v41 = vrot.slane %v1444_v57, 2 }
 0x224   : > { %v1344_v58 = vrot.slane %v1343_v12, 1  ;;  %v1446_v42 = vadd.f32 %v1445_v41, %v1444_v57 }
 0x226   : > { %v1345_v59 = vadd.f32 %v1344_v58, %v1343_v12  ;;  %v1447_v60 = vrot.slane %v1446_v42, 1 }
 0x228   : > { %1347 = vst.msk [vmem:[%s422_s12] sm:$0x1] %vm1346_vm5, %v1345_v59  ;;  %v1448_v61 = vadd.f32 %v1447_v60, %v1446_v42 }
 0x22a   : > { %1449 = vst.msk [vmem:[%s422_s12 + $0x1] sm:$0x1] %vm1346_vm5, %v1448_v61 }
 0x22b PF: > { %s15_s20 = sadd.s32 1, %s1787_s20   ;;  %s2349_s18 = smov %s1783_s19 }
 0x22c   : > { %p12_p5 = scmp.ge.s32.totalorder %s15_s20, 4   ;;  %s2350_s19 = smov %s2352_s1 }
 0x22e   :  { %14 = sbr.rel (!%p12_p5) target bundleno = 2 (0x2), region = 79 }

// kernel: upsampler_block_forward.3
= control target key start
LH: loop header
LB: loop body
LE: loop exit
PB: predicated region body
PF: predicated region fallthrough
CT: control target
= control target key end

     0   :  { %s1875_s24 = smov 0   ;;  %s1877_s1 = smov 0   ;;  %s2480_s0 = inlined_call_operand.vmem [shape: f32[2,256,4], index: 0, kind: input, shape index: {}, may-alias: {0,1}]   ;;  %s2481_s1 = inlined_call_operand.vmem [shape: f32[2,256,4], index: 1, kind: input, shape index: {}, may-alias: {0,1}]   ;;  %s2482_s2 = inlined_call_operand.vmem [shape: f32[2,256,4], index: 2, kind: input, shape index: {}, may-alias: {2,3}]   ;;  %s2483_s3 = inlined_call_operand.vmem [shape: f32[2,256,4], index: 3, kind: input, shape index: {}, may-alias: {2,3}]   ;;  %s2484_s4 = inlined_call_operand.vmem [shape: f32[16,32], index: 4, kind: input, shape index: {}]   ;;  %s2485_s5 = inlined_call_operand.vmem [shape: f32[1,32], index: 5, kind: input, shape index: {}]   ;;  %s2486_s6 = inlined_call_operand.vmem [shape: f32[1,32], index: 6, kind: input, shape index: {}]   ;;  %s2487_s7 = inlined_call_operand.vmem [shape: f32[2,256,32], index: 7, kind: output, shape index: {}]  }
   0x1   :  { %s1879_s25 = smov 0  }
   0x2 LB: > { %s29_s3 = sadd.s32 1, %s1825_s1  ;;  %p1623_p0 = scmp.ge.s32.totalorder %s1829_s25, 1  ;;  %s1829_s25 = sphi %s1879_s25, %s17_s25   ;;  %s1825_s1 = sphi %s1877_s1, %s2489_s1   ;;  %s1821_s24 = sphi %s1875_s24, %s2488_s24  }
   0x3   : > { %p31_p1 = scmp.ge.s32.totalorder %s29_s3, 2  ;;  %p341_p2 = scmp.lt.s32.totalorder %s1829_s25, 3 }
   0x5   : > { %s2491_s3 = smov (%p31_p1, %s29_s3), 0  ;;  %p342_p3 = pnand %p1623_p0, %p341_p2 }
   0x6   : > { %p417_p4 = scmp.lt.s32.totalorder (!%p342_p3), %s1821_s24, 1  ;;  %s1831_s30 = smov (!%p342_p3), 4   ;;  %v1011_v12 = vld [vmem:[%s2484_s4] sm:$0xff] (!%p342_p3)  ;;  %v1012_v13 = vld [vmem:[%s2484_s4 + $0x8] sm:$0xff] (!%p342_p3)  ;;  %vm912_vm0 = vcmask (!%p342_p3), 31744   ;;  %vm945_vm1 = vcmask (!%p342_p3), 64512  }
   0x7   : > { %345 = sbr.rel (%p342_p3) target bundleno = 542 (0x21e), region = 48  ;;  %s1832_s11 = smov (!%p342_p3), 8   ;;  %v1763_v14 = vpack.c.bf16 (!%p342_p3), %v1012_v13, %v1011_v12  ;;  %vm978_vm2 = vcmask (!%p342_p3), 97280   ;;  %vm1013_vm3 = vcmask (!%p342_p3), 130048   ;;  %vm1445_vm4 = vcmask (!%p342_p3), 261120  }
   0x8   : > { %s1833_s12 = smov (!%p342_p3), 12  }
   0x9   : > { %1764 = vmatprep.subr.bf16.mxu0 (!%p342_p3), %v1763_v14  ;;  %1767 = vmatprep.subr.bf16.mxu1 (!%p342_p3), %v1763_v14 }
   0xa   : > { %1766 = vmatpush3.bf16.msra.mxu0 (!%p342_p3), %v1763_v14  ;;  %1768 = vmatpush3.bf16.msra.mxu1 (!%p342_p3), %v1763_v14 }
   0xe   : > { %s2493_s24 = smov (!%p417_p4, %s1821_s24), 1 }
   0xf   : > { %s1893_s26 = sshll.u32 %s2493_s24, 8 }
  0x10   : > { %s1899_s29 = scalar_lea.vmem %s2482_s2, %s1893_s26  ;;  %s1915_s10 = scalar_lea.vmem %s2480_s0, %s1893_s26 }
  0x11   : > { %v515_v0 = vld [vmem:[%s1899_s29 + $0x8] sm:$0xff]  ;;  %v514_v1 = vld [vmem:[%s1899_s29] sm:$0xff]  ;;  %v1922_v4 = vld [vmem:[%s1915_s10 + $0x90] sm:$0xff]  ;;  %s2346_s23 = scalar_lea.vmem %s2487_s7, %s1893_s26 }
  0x12   : > { %592 = vrot.lane.b32.xlu1 %v515_v0, %s1831_s30  ;;  %590 = vrot.lane.b32.xlu0 %v514_v1, %s1831_s30  ;;  %v1906_v2 = vld [vmem:[%s1899_s29 + $0x88] sm:$0xff]  ;;  %v1909_v3 = vld [vmem:[%s1899_s29 + $0x80] sm:$0xff] }
  0x13   : > { %v1925_v5 = vld [vmem:[%s1915_s10 + $0x10] sm:$0xff]  ;;  %v1932_v6 = vld [vmem:[%s1915_s10 + $0x98] sm:$0xff]  ;;  %v1960_v15 = vld [vmem:[%s1915_s10 + $0xa0] sm:$0xff] }
  0x14   : > { %v1935_v7 = vld [vmem:[%s1915_s10 + $0x18] sm:$0xff]  ;;  %v532_v8 = vld [vmem:[%s1899_s29 + $0x90] sm:$0xff]  ;;  %v1963_v16 = vld [vmem:[%s1915_s10 + $0x20] sm:$0xff] }
  0x15   : > { %v516_v9 = vld [vmem:[%s1899_s29 + $0x10] sm:$0xff]  ;;  %v533_v10 = vld [vmem:[%s1899_s29 + $0x98] sm:$0xff]  ;;  %v1970_v17 = vld [vmem:[%s1915_s10 + $0xa8] sm:$0xff] }
  0x16   : > { %624 = vrot.lane.b32.xlu1 %v1906_v2, %s1831_s30  ;;  %622 = vrot.lane.b32.xlu0 %v1909_v3, %s1831_s30  ;;  %v517_v11 = vld [vmem:[%s1899_s29 + $0x18] sm:$0xff]  ;;  %v1973_v18 = vld [vmem:[%s1915_s10 + $0x28] sm:$0xff] }
  0x17   : > { %v534_v19 = vld [vmem:[%s1899_s29 + $0xa0] sm:$0xff]  ;;  %v535_v21 = vld [vmem:[%s1899_s29 + $0xa8] sm:$0xff]  ;;  %v1992_v23 = vld [vmem:[%s1915_s10 + $0xb0] sm:$0xff] }
  0x18   : > { %v518_v20 = vld [vmem:[%s1899_s29 + $0x20] sm:$0xff]  ;;  %v519_v22 = vld [vmem:[%s1899_s29 + $0x28] sm:$0xff]  ;;  %v1995_v24 = vld [vmem:[%s1915_s10 + $0x30] sm:$0xff] }
  0x19   : > { %v2002_v25 = vld [vmem:[%s1915_s10 + $0xb8] sm:$0xff]  ;;  %v536_v27 = vld [vmem:[%s1899_s29 + $0xb0] sm:$0xff]  ;;  %v2024_v31 = vld [vmem:[%s1915_s10 + $0xc0] sm:$0xff] }
  0x1a   : > { %750 = vrot.lane.b32.xlu1 %v1922_v4, %s1832_s11  ;;  %718 = vrot.lane.b32.xlu0 %v1925_v5, %s1832_s11  ;;  %v2005_v26 = vld [vmem:[%s1915_s10 + $0x38] sm:$0xff]  ;;  %v520_v28 = vld [vmem:[%s1899_s29 + $0x30] sm:$0xff] }
  0x1b   : > { %v537_v29 = vld [vmem:[%s1899_s29 + $0xb8] sm:$0xff]  ;;  %v2027_v32 = vld [vmem:[%s1915_s10 + $0x40] sm:$0xff]  ;;  %v2034_v33 = vld [vmem:[%s1915_s10 + $0xc8] sm:$0xff] }
  0x1c   : > { %v521_v30 = vld [vmem:[%s1899_s29 + $0x38] sm:$0xff]  ;;  %v2037_v34 = vld [vmem:[%s1915_s10 + $0x48] sm:$0xff]  ;;  %v538_v35 = vld [vmem:[%s1899_s29 + $0xc0] sm:$0xff] }
  0x1d   : > { %v522_v36 = vld [vmem:[%s1899_s29 + $0x40] sm:$0xff]  ;;  %v539_v37 = vld [vmem:[%s1899_s29 + $0xc8] sm:$0xff]  ;;  %v2056_v39 = vld [vmem:[%s1915_s10 + $0xd0] sm:$0xff] }
  0x1e   : > { %752 = vrot.lane.b32.xlu1 %v1932_v6, %s1832_s11  ;;  %720 = vrot.lane.b32.xlu0 %v1935_v7, %s1832_s11  ;;  %v523_v38 = vld [vmem:[%s1899_s29 + $0x48] sm:$0xff]  ;;  %v2059_v40 = vld [vmem:[%s1915_s10 + $0x50] sm:$0xff] }
  0x1f   : > { %v2066_v41 = vld [vmem:[%s1915_s10 + $0xd8] sm:$0xff]  ;;  %v540_v43 = vld [vmem:[%s1899_s29 + $0xd0] sm:$0xff]  ;;  %v2088_v53 = vld [vmem:[%s1915_s10 + $0xe0] sm:$0xff] }
  0x20   : > { %v2069_v42 = vld [vmem:[%s1915_s10 + $0x58] sm:$0xff]  ;;  %v524_v44 = vld [vmem:[%s1899_s29 + $0x50] sm:$0xff]  ;;  %v2091_v54 = vld [vmem:[%s1915_s10 + $0x60] sm:$0xff] }
  0x21   : > { %v541_v45 = vld [vmem:[%s1899_s29 + $0xd8] sm:$0xff]  ;;  %v482_v55 = vld [vmem:[%s1915_s10] sm:$0xff]  ;;  %v2105_v61 = vld [vmem:[%s1915_s10 + $0xe8] sm:$0xff] }
  0x22   : > { %848 = vrot.lane.b32.xlu1 %v532_v8, %s1833_s12  ;;  %816 = vrot.lane.b32.xlu0 %v516_v9, %s1833_s12  ;;  %v525_v46 = vld [vmem:[%s1899_s29 + $0x58] sm:$0xff]  ;;  %v2095_v56 = vld [vmem:[%s1915_s10 + $0x80] sm:$0xff] }
  0x23   : > { %v483_v62 = vld [vmem:[%s1915_s10 + $0x8] sm:$0xff] }
  0x24   : > { %v2109_v63 = vld [vmem:[%s1915_s10 + $0x88] sm:$0xff] }
  0x26   : > { %850 = vrot.lane.b32.xlu1 %v533_v10, %s1833_s12  ;;  %818 = vrot.lane.b32.xlu0 %v517_v11, %s1833_s12 }
  0x2a   : > { %626 = vrot.lane.b32.xlu1 %v532_v8, %s1831_s30  ;;  %594 = vrot.lane.b32.xlu0 %v516_v9, %s1831_s30 }
  0x2e   : > { %628 = vrot.lane.b32.xlu1 %v533_v10, %s1831_s30  ;;  %596 = vrot.lane.b32.xlu0 %v517_v11, %s1831_s30  ;;  %v2114_v10 = vld [vmem:[%s1915_s10 + $0x68] sm:$0xff] }
  0x32   : > { %754 = vrot.lane.b32.xlu1 %v1960_v15, %s1832_s11  ;;  %722 = vrot.lane.b32.xlu0 %v1963_v16, %s1832_s11 }
  0x36   : > { %756 = vrot.lane.b32.xlu1 %v1970_v17, %s1832_s11  ;;  %724 = vrot.lane.b32.xlu0 %v1973_v18, %s1832_s11 }
  0x3a   : > { %852 = vrot.lane.b32.xlu1 %v534_v19, %s1833_s12  ;;  %820 = vrot.lane.b32.xlu0 %v518_v20, %s1833_s12 }
  0x3e   : > { %854 = vrot.lane.b32.xlu1 %v535_v21, %s1833_s12  ;;  %822 = vrot.lane.b32.xlu0 %v519_v22, %s1833_s12 }
  0x42   : > { %630 = vrot.lane.b32.xlu1 %v534_v19, %s1831_s30  ;;  %598 = vrot.lane.b32.xlu0 %v518_v20, %s1831_s30  ;;  %v542_v19 = vld [vmem:[%s1899_s29 + $0xe0] sm:$0xff] }
  0x46   : > { %632 = vrot.lane.b32.xlu1 %v535_v21, %s1831_s30  ;;  %600 = vrot.lane.b32.xlu0 %v519_v22, %s1831_s30 }
  0x4a   : > { %758 = vrot.lane.b32.xlu1 %v1992_v23, %s1832_s11  ;;  %726 = vrot.lane.b32.xlu0 %v1995_v24, %s1832_s11 }
  0x4e   : > { %760 = vrot.lane.b32.xlu1 %v2002_v25, %s1832_s11  ;;  %728 = vrot.lane.b32.xlu0 %v2005_v26, %s1832_s11 }
  0x52   : > { %856 = vrot.lane.b32.xlu1 %v536_v27, %s1833_s12  ;;  %824 = vrot.lane.b32.xlu0 %v520_v28, %s1833_s12 }
  0x56   : > { %858 = vrot.lane.b32.xlu1 %v537_v29, %s1833_s12  ;;  %826 = vrot.lane.b32.xlu0 %v521_v30, %s1833_s12 }
  0x5a   : > { %634 = vrot.lane.b32.xlu1 %v536_v27, %s1831_s30  ;;  %602 = vrot.lane.b32.xlu0 %v520_v28, %s1831_s30  ;;  %v526_v28 = vld [vmem:[%s1899_s29 + $0x60] sm:$0xff] }
  0x5e   : > { %636 = vrot.lane.b32.xlu1 %v537_v29, %s1831_s30  ;;  %604 = vrot.lane.b32.xlu0 %v521_v30, %s1831_s30 }
  0x62   : > { %762 = vrot.lane.b32.xlu1 %v2024_v31, %s1832_s11  ;;  %730 = vrot.lane.b32.xlu0 %v2027_v32, %s1832_s11 }
  0x66   : > { %764 = vrot.lane.b32.xlu1 %v2034_v33, %s1832_s11  ;;  %732 = vrot.lane.b32.xlu0 %v2037_v34, %s1832_s11 }
  0x6a   : > { %860 = vrot.lane.b32.xlu1 %v538_v35, %s1833_s12  ;;  %828 = vrot.lane.b32.xlu0 %v522_v36, %s1833_s12 }
  0x6e   : > { %862 = vrot.lane.b32.xlu1 %v539_v37, %s1833_s12  ;;  %830 = vrot.lane.b32.xlu0 %v523_v38, %s1833_s12 }
  0x72   : > { %638 = vrot.lane.b32.xlu1 %v538_v35, %s1831_s30  ;;  %606 = vrot.lane.b32.xlu0 %v522_v36, %s1831_s30  ;;  %v543_v35 = vld [vmem:[%s1899_s29 + $0xe8] sm:$0xff] }
  0x76   : > { %640 = vrot.lane.b32.xlu1 %v539_v37, %s1831_s30  ;;  %608 = vrot.lane.b32.xlu0 %v523_v38, %s1831_s30  ;;  %v527_v38 = vld [vmem:[%s1899_s29 + $0x68] sm:$0xff] }
  0x7a   : > { %766 = vrot.lane.b32.xlu1 %v2056_v39, %s1832_s11  ;;  %734 = vrot.lane.b32.xlu0 %v2059_v40, %s1832_s11 }
  0x7e   : > { %768 = vrot.lane.b32.xlu1 %v2066_v41, %s1832_s11  ;;  %736 = vrot.lane.b32.xlu0 %v2069_v42, %s1832_s11 }
  0x82   : > { %864 = vrot.lane.b32.xlu1 %v540_v43, %s1833_s12  ;;  %832 = vrot.lane.b32.xlu0 %v524_v44, %s1833_s12 }
  0x84   : > { %v593_v47 = vpop.permute.xlu1 %592  ;;  %v591_v48 = vpop.permute.xlu0 %590 }
  0x85   : > { %v913_v59 = vsel %vm912_vm0, %v482_v55, %v591_v48  ;;  %v914_v13 = vsel %vm912_vm0, %v483_v62, %v593_v47  ;;  %v2146_v47 = vld [vmem:[%s1915_s10 + $0xf0] sm:$0xff]  ;;  %v2160_v55 = vld [vmem:[%s1915_s10 + $0xf8] sm:$0xff] }
  0x86   : > { %866 = vrot.lane.b32.xlu1 %v541_v45, %s1833_s12  ;;  %834 = vrot.lane.b32.xlu0 %v525_v46, %s1833_s12  ;;  %v2165_v62 = vld [vmem:[%s1915_s10 + $0x78] sm:$0xff] }
  0x88   : > { %v625_v49 = vpop.permute.xlu1 %624  ;;  %v623_v50 = vpop.permute.xlu0 %622 }
  0x89   : > { %v929_v60 = vsel %vm912_vm0, %v2095_v56, %v623_v50  ;;  %v930_v14 = vsel %vm912_vm0, %v2109_v63, %v625_v49  ;;  %v2149_v50 = vld [vmem:[%s1915_s10 + $0x70] sm:$0xff] }
  0x8a   : > { %642 = vrot.lane.b32.xlu1 %v540_v43, %s1831_s30  ;;  %610 = vrot.lane.b32.xlu0 %v524_v44, %s1831_s30 }
  0x8c   : > { %v751_v51 = vpop.permute.xlu1 %750  ;;  %v719_v52 = vpop.permute.xlu0 %718 }
  0x8d   : > { %v962_v0 = vsel %vm945_vm1, %v929_v60, %v751_v51  ;;  %v946_v1 = vsel %vm945_vm1, %v913_v59, %v719_v52 }
  0x8e   : > { %644 = vrot.lane.b32.xlu1 %v541_v45, %s1831_s30  ;;  %612 = vrot.lane.b32.xlu0 %v525_v46, %s1831_s30 }
  0x90   : > { %v753_v57 = vpop.permute.xlu1 %752  ;;  %v721_v58 = vpop.permute.xlu0 %720 }
  0x91   : > { %v963_v20 = vsel %vm945_vm1, %v930_v14, %v753_v57  ;;  %v947_v21 = vsel %vm945_vm1, %v914_v13, %v721_v58  ;;  %v528_v14 = vld [vmem:[%s1899_s29 + $0x70] sm:$0xff] }
  0x92   : > { %770 = vrot.lane.b32.xlu1 %v2088_v53, %s1832_s11  ;;  %738 = vrot.lane.b32.xlu0 %v2091_v54, %s1832_s11 }
  0x94   : > { %v849_v8 = vpop.permute.xlu1 %848  ;;  %v817_v9 = vpop.permute.xlu0 %816 }
  0x95   : > { %v995_v11 = vsel %vm978_vm2, %v962_v0, %v849_v8  ;;  %v979_v12 = vsel %vm978_vm2, %v946_v1, %v817_v9  ;;  %v544_v8 = vld [vmem:[%s1899_s29 + $0xf0] sm:$0xff] }
  0x96   : > { %772 = vrot.lane.b32.xlu1 %v2105_v61, %s1832_s11  ;;  %1739 = vmatprep.mubr.msk.f32.mxu1 %vm1013_vm3, %v995_v11 }
  0x97   : > { %740 = vrot.lane.b32.xlu0 %v2114_v10, %s1832_s11  ;;  %1715 = vmatprep.mubr.msk.f32.mxu0 %vm1013_vm3, %v979_v12 }
  0x98   : > { %v851_v22 = vpop.permute.xlu1 %850  ;;  %v819_v27 = vpop.permute.xlu0 %818 }
  0x99   : > { %v996_v29 = vsel %vm978_vm2, %v963_v20, %v851_v22  ;;  %v980_v30 = vsel %vm978_vm2, %v947_v21, %v819_v27  ;;  %v529_v22 = vld [vmem:[%s1899_s29 + $0x78] sm:$0xff] }
  0x9a   : > { %868 = vrot.lane.b32.xlu1 %v542_v19, %s1833_s12  ;;  %1740 = vmatmul.mubr.msk.f32.vlgmr.msra.gmra.mrb[0].mxu1 %vm1013_vm3, %v996_v29 }
  0x9b   : > { %836 = vrot.lane.b32.xlu0 %v526_v28, %s1833_s12  ;;  %1716 = vmatmul.mubr.msk.f32.vlgmr.msra.gmra.mrb[0].mxu0 %vm1013_vm3, %v980_v30 }
  0x9c   : > { %v627_v36 = vpop.permute.xlu1 %626  ;;  %v595_v37 = vpop.permute.xlu0 %594 }
  0x9d   : > { %v931_v51 = vsel %vm912_vm0, %v1922_v4, %v627_v36  ;;  %v915_v52 = vsel %vm912_vm0, %v1925_v5, %v595_v37  ;;  %v1834_v37 = vmov 0.0  }
  0x9e   : > { %870 = vrot.lane.b32.xlu1 %v543_v35, %s1833_s12 }
  0x9f   : > { %838 = vrot.lane.b32.xlu0 %v527_v38, %s1833_s12 }
  0xa0   : > { %v629_v43 = vpop.permute.xlu1 %628  ;;  %v597_v44 = vpop.permute.xlu0 %596 }
  0xa1   : > { %v932_v5 = vsel %vm912_vm0, %v1932_v6, %v629_v43  ;;  %v916_v1 = vsel %vm912_vm0, %v1935_v7, %v597_v44  ;;  %v545_v7 = vld [vmem:[%s1899_s29 + $0xf8] sm:$0xff] }
  0xa2   : > { %646 = vrot.lane.b32.xlu1 %v542_v19, %s1831_s30 }
  0xa3   : > { %614 = vrot.lane.b32.xlu0 %v526_v28, %s1831_s30 }
  0xa4   : > { %v755_v45 = vpop.permute.xlu1 %754  ;;  %v723_v46 = vpop.permute.xlu0 %722 }
  0xa5   : > { %v964_v57 = vsel %vm945_vm1, %v931_v51, %v755_v45  ;;  %v948_v58 = vsel %vm945_vm1, %v915_v52, %v723_v46 }
  0xa6   : > { %648 = vrot.lane.b32.xlu1 %v543_v35, %s1831_s30 }
  0xa7   : > { %616 = vrot.lane.b32.xlu0 %v527_v38, %s1831_s30 }
  0xa8   : > { %v757_v48 = vpop.permute.xlu1 %756  ;;  %v725_v49 = vpop.permute.xlu0 %724 }
  0xa9   : > { %v965_v9 = vsel %vm945_vm1, %v932_v5, %v757_v48  ;;  %v949_v11 = vsel %vm945_vm1, %v916_v1, %v725_v49 }
  0xaa   : > { %774 = vrot.lane.b32.xlu1 %v2146_v47, %s1832_s11 }
  0xab   : > { %742 = vrot.lane.b32.xlu0 %v2149_v50, %s1832_s11 }
  0xac   : > { %v853_v59 = vpop.permute.xlu1 %852  ;;  %v821_v60 = vpop.permute.xlu0 %820 }
  0xad   : > { %v997_v4 = vsel %vm978_vm2, %v964_v57, %v853_v59  ;;  %v981_v0 = vsel %vm978_vm2, %v948_v58, %v821_v60 }
  0xae   : > { %776 = vrot.lane.b32.xlu1 %v2160_v55, %s1832_s11  ;;  %1742 = vmatprep.mubr.msk.f32.mxu1 %vm1013_vm3, %v997_v4 }
  0xaf   : > { %744 = vrot.lane.b32.xlu0 %v2165_v62, %s1832_s11  ;;  %1718 = vmatprep.mubr.msk.f32.mxu0 %vm1013_vm3, %v981_v0 }
  0xb0   : > { %v855_v12 = vpop.permute.xlu1 %854  ;;  %v823_v13 = vpop.permute.xlu0 %822 }
  0xb1   : > { %v998_v6 = vsel %vm978_vm2, %v965_v9, %v855_v12  ;;  %v982_v19 = vsel %vm978_vm2, %v949_v11, %v823_v13 }
  0xb2   : > { %872 = vrot.lane.b32.xlu1 %v544_v8, %s1833_s12  ;;  %1743 = vmatmul.mubr.msk.f32.gmra.mrb[2].mxu1 %vm1013_vm3, %v998_v6 }
  0xb3   : > { %840 = vrot.lane.b32.xlu0 %v528_v14, %s1833_s12  ;;  %1719 = vmatmul.mubr.msk.f32.gmra.mrb[2].mxu0 %vm1013_vm3, %v982_v19 }
  0xb4   : > { %v631_v20 = vpop.permute.xlu1 %630  ;;  %v599_v21 = vpop.permute.xlu0 %598 }
  0xb5   : > { %v933_v38 = vsel %vm912_vm0, %v1960_v15, %v631_v20  ;;  %v917_v43 = vsel %vm912_vm0, %v1963_v16, %v599_v21 }
  0xb6   : > { %874 = vrot.lane.b32.xlu1 %v545_v7, %s1833_s12 }
  0xb7   : > { %842 = vrot.lane.b32.xlu0 %v529_v22, %s1833_s12 }
  0xb8   : > { %v633_v27 = vpop.permute.xlu1 %632  ;;  %v601_v28 = vpop.permute.xlu0 %600 }
  0xb9   : > { %v934_v15 = vsel %vm912_vm0, %v1970_v17, %v633_v27  ;;  %v918_v16 = vsel %vm912_vm0, %v1973_v18, %v601_v28 }
  0xba   : > { %650 = vrot.lane.b32.xlu1 %v544_v8, %s1831_s30 }
  0xbb   : > { %618 = vrot.lane.b32.xlu0 %v528_v14, %s1831_s30 }
  0xbc   : > { %v759_v29 = vpop.permute.xlu1 %758  ;;  %v727_v30 = vpop.permute.xlu0 %726 }
  0xbd   : > { %v966_v44 = vsel %vm945_vm1, %v933_v38, %v759_v29  ;;  %v950_v45 = vsel %vm945_vm1, %v917_v43, %v727_v30 }
  0xbe   : > { %652 = vrot.lane.b32.xlu1 %v545_v7, %s1831_s30 }
  0xbf   : > { %620 = vrot.lane.b32.xlu0 %v529_v22, %s1831_s30 }
  0xc0   : > { %v761_v35 = vpop.permute.xlu1 %760  ;;  %v729_v36 = vpop.permute.xlu0 %728 }
  0xc1   : > { %v951_v52 = vsel %vm945_vm1, %v918_v16, %v729_v36 }
  0xc2   : > { %1798 = vrot.lane.b32.xlu1 %v1834_v37, %s1832_s11 }
  0xc3   : > { %746 = vrot.lane.b32.xlu0 %v2095_v56, %s1832_s11  ;;  %v967_v56 = vsel %vm945_vm1, %v934_v15, %v761_v35 }
  0xc4   : > { %v857_v46 = vpop.permute.xlu1 %856  ;;  %v825_v48 = vpop.permute.xlu0 %824 }
  0xc5   : > { %v999_v49 = vsel %vm978_vm2, %v966_v44, %v857_v46  ;;  %v983_v51 = vsel %vm978_vm2, %v950_v45, %v825_v48 }
  0xc6   : > { %844 = vrot.lane.b32.xlu1 %v1909_v3, %s1833_s12  ;;  %1745 = vmatprep.mubr.msk.f32.mxu1 %vm1013_vm3, %v999_v49 }
  0xc7   : > { %748 = vrot.lane.b32.xlu0 %v2109_v63, %s1832_s11  ;;  %1721 = vmatprep.mubr.msk.f32.mxu0 %vm1013_vm3, %v983_v51 }
  0xc8   : > { %v859_v57 = vpop.permute.xlu1 %858  ;;  %v827_v58 = vpop.permute.xlu0 %826 }
  0xc9   : > { %v1000_v3 = vsel %vm978_vm2, %v967_v56, %v859_v57  ;;  %v984_v59 = vsel %vm978_vm2, %v951_v52, %v827_v58 }
  0xca   : > { %846 = vrot.lane.b32.xlu1 %v1906_v2, %s1833_s12  ;;  %1746 = vmatmul.mubr.msk.f32.gmra.mrb[4].mxu1 %vm1013_vm3, %v1000_v3 }
  0xcb   : > { %1803 = vrot.lane.b32.xlu0 %v1834_v37, %s1833_s12  ;;  %1722 = vmatmul.mubr.msk.f32.gmra.mrb[4].mxu0 %vm1013_vm3, %v984_v59 }
  0xcc   : > { %v635_v17 = vpop.permute.xlu1 %634  ;;  %v603_v18 = vpop.permute.xlu0 %602 }
  0xcd   : > { %v935_v8 = vsel %vm912_vm0, %v1992_v23, %v635_v17  ;;  %v919_v2 = vsel %vm912_vm0, %v1995_v24, %v603_v18 }
  0xd0   : > { %v637_v63 = vpop.permute.xlu1 %636  ;;  %v605_v60 = vpop.permute.xlu0 %604 }
  0xd1   : > { %v936_v23 = vsel %vm912_vm0, %v2002_v25, %v637_v63  ;;  %v920_v24 = vsel %vm912_vm0, %v2005_v26, %v605_v60 }
  0xd4   : > { %v763_v4 = vpop.permute.xlu1 %762  ;;  %v731_v0 = vpop.permute.xlu0 %730 }
  0xd5   : > { %v968_v9 = vsel %vm945_vm1, %v935_v8, %v763_v4  ;;  %v952_v11 = vsel %vm945_vm1, %v919_v2, %v731_v0 }
  0xd8   : > { %v765_v5 = vpop.permute.xlu1 %764  ;;  %v733_v1 = vpop.permute.xlu0 %732 }
  0xd9   : > { %v969_v19 = vsel %vm945_vm1, %v936_v23, %v765_v5  ;;  %v953_v7 = vsel %vm945_vm1, %v920_v24, %v733_v1 }
  0xdc   : > { %v861_v12 = vpop.permute.xlu1 %860  ;;  %v829_v13 = vpop.permute.xlu0 %828 }
  0xdd   : > { %v1001_v14 = vsel %vm978_vm2, %v968_v9, %v861_v12  ;;  %v985_v6 = vsel %vm978_vm2, %v952_v11, %v829_v13 }
  0xde   : > { %1724 = vmatprep.mubr.msk.f32.mxu0 %vm1013_vm3, %v985_v6  ;;  %1748 = vmatprep.mubr.msk.f32.mxu1 %vm1013_vm3, %v1001_v14 }
  0xe0   : > { %v863_v20 = vpop.permute.xlu1 %862  ;;  %v831_v21 = vpop.permute.xlu0 %830 }
  0xe1   : > { %v1002_v22 = vsel %vm978_vm2, %v969_v19, %v863_v20  ;;  %v986_v27 = vsel %vm978_vm2, %v953_v7, %v831_v21 }
  0xe2   : > { %1725 = vmatmul.mubr.msk.f32.gmra.mrb[6].mxu0 %vm1013_vm3, %v986_v27  ;;  %1749 = vmatmul.mubr.msk.f32.gmra.mrb[6].mxu1 %vm1013_vm3, %v1002_v22 }
  0xe4   : > { %v639_v28 = vpop.permute.xlu1 %638  ;;  %v607_v29 = vpop.permute.xlu0 %606 }
  0xe5   : > { %v937_v38 = vsel %vm912_vm0, %v2024_v31, %v639_v28  ;;  %v921_v43 = vsel %vm912_vm0, %v2027_v32, %v607_v29 }
  0xe8   : > { %v641_v25 = vpop.permute.xlu1 %640  ;;  %v609_v30 = vpop.permute.xlu0 %608 }
  0xe9   : > { %v938_v31 = vsel %vm912_vm0, %v2034_v33, %v641_v25  ;;  %v922_v32 = vsel %vm912_vm0, %v2037_v34, %v609_v30 }
  0xec   : > { %v767_v35 = vpop.permute.xlu1 %766  ;;  %v735_v26 = vpop.permute.xlu0 %734 }
  0xed   : > { %v970_v44 = vsel %vm945_vm1, %v937_v38, %v767_v35  ;;  %v954_v45 = vsel %vm945_vm1, %v921_v43, %v735_v26 }
  0xf0   : > { %v769_v36 = vpop.permute.xlu1 %768  ;;  %v737_v37 = vpop.permute.xlu0 %736 }
  0xf1   : > { %v971_v15 = vsel %vm945_vm1, %v938_v31, %v769_v36  ;;  %v955_v16 = vsel %vm945_vm1, %v922_v32, %v737_v37 }
  0xf4   : > { %v865_v46 = vpop.permute.xlu1 %864  ;;  %v833_v48 = vpop.permute.xlu0 %832 }
  0xf5   : > { %v1003_v49 = vsel %vm978_vm2, %v970_v44, %v865_v46  ;;  %v987_v51 = vsel %vm978_vm2, %v954_v45, %v833_v48 }
  0xf6   : > { %1727 = vmatprep.mubr.msk.f32.mxu0 %vm1013_vm3, %v987_v51  ;;  %1751 = vmatprep.mubr.msk.f32.mxu1 %vm1013_vm3, %v1003_v49 }
  0xf8   : > { %v867_v56 = vpop.permute.xlu1 %866  ;;  %v835_v52 = vpop.permute.xlu0 %834 }
  0xf9   : > { %v1004_v57 = vsel %vm978_vm2, %v971_v15, %v867_v56  ;;  %v988_v58 = vsel %vm978_vm2, %v955_v16, %v835_v52 }
  0xfa   : > { %1728 = vmatmul.mubr.msk.f32.gmra.mrb[8].mxu0 %vm1013_vm3, %v988_v58  ;;  %1752 = vmatmul.mubr.msk.f32.gmra.mrb[8].mxu1 %vm1013_vm3, %v1004_v57 }
  0xfc   : > { %v643_v3 = vpop.permute.xlu1 %642  ;;  %v611_v59 = vpop.permute.xlu0 %610 }
  0xfd   : > { %v939_v4 = vsel %vm912_vm0, %v2056_v39, %v643_v3  ;;  %v923_v0 = vsel %vm912_vm0, %v2059_v40, %v611_v59 }
 0x100   : > { %v645_v33 = vpop.permute.xlu1 %644  ;;  %v613_v17 = vpop.permute.xlu0 %612 }
 0x101   : > { %v940_v12 = vsel %vm912_vm0, %v2066_v41, %v645_v33  ;;  %v924_v39 = vsel %vm912_vm0, %v2069_v42, %v613_v17 }
 0x104   : > { %v771_v18 = vpop.permute.xlu1 %770  ;;  %v739_v34 = vpop.permute.xlu0 %738 }
 0x105   : > { %v972_v5 = vsel %vm945_vm1, %v939_v4, %v771_v18  ;;  %v956_v8 = vsel %vm945_vm1, %v923_v0, %v739_v34 }
 0x108   : > { %v773_v63 = vpop.permute.xlu1 %772 }
 0x109   : > { %v741_v60 = vpop.permute.xlu0 %740  ;;  %v973_v40 = vsel %vm945_vm1, %v940_v12, %v773_v63 }
 0x10a   : > { %v957_v14 = vsel %vm945_vm1, %v924_v39, %v741_v60 }
 0x10c   : > { %v869_v1 = vpop.permute.xlu1 %868 }
 0x10d   : > { %v1005_v2 = vsel %vm978_vm2, %v972_v5, %v869_v1  ;;  %v837_v9 = vpop.permute.xlu0 %836 }
 0x10e   : > { %v989_v11 = vsel %vm978_vm2, %v956_v8, %v837_v9  ;;  %1754 = vmatprep.mubr.msk.f32.mxu1 %vm1013_vm3, %v1005_v2 }
 0x10f   : > { %1730 = vmatprep.mubr.msk.f32.mxu0 %vm1013_vm3, %v989_v11 }
 0x110   : > { %v871_v13 = vpop.permute.xlu1 %870 }
 0x111   : > { %v1006_v6 = vsel %vm978_vm2, %v973_v40, %v871_v13  ;;  %v839_v23 = vpop.permute.xlu0 %838 }
 0x112   : > { %v990_v24 = vsel %vm978_vm2, %v957_v14, %v839_v23  ;;  %1755 = vmatmul.mubr.msk.f32.gmra.mrb[10].mxu1 %vm1013_vm3, %v1006_v6 }
 0x113   : > { %1731 = vmatmul.mubr.msk.f32.gmra.mrb[10].mxu0 %vm1013_vm3, %v990_v24 }
 0x114   : > { %v647_v41 = vpop.permute.xlu1 %646 }
 0x115   : > { %v615_v19 = vpop.permute.xlu0 %614  ;;  %v941_v28 = vsel %vm912_vm0, %v2088_v53, %v647_v41 }
 0x116   : > { %v925_v29 = vsel %vm912_vm0, %v2091_v54, %v615_v19 }
 0x118   : > { %v649_v7 = vpop.permute.xlu1 %648 }
 0x119   : > { %v617_v20 = vpop.permute.xlu0 %616  ;;  %v942_v38 = vsel %vm912_vm0, %v2105_v61, %v649_v7 }
 0x11a   : > { %v926_v53 = vsel %vm912_vm0, %v2114_v10, %v617_v20 }
 0x11c   : > { %v775_v21 = vpop.permute.xlu1 %774 }
 0x11d   : > { %v743_v42 = vpop.permute.xlu0 %742  ;;  %v974_v25 = vsel %vm945_vm1, %v941_v28, %v775_v21 }
 0x11e   : > { %v958_v35 = vsel %vm945_vm1, %v925_v29, %v743_v42 }
 0x120   : > { %v777_v22 = vpop.permute.xlu1 %776 }
 0x121   : > { %v745_v27 = vpop.permute.xlu0 %744  ;;  %v975_v54 = vsel %vm945_vm1, %v942_v38, %v777_v22 }
 0x122   : > { %v959_v44 = vsel %vm945_vm1, %v926_v53, %v745_v27 }
 0x124   : > { %v873_v30 = vpop.permute.xlu1 %872 }
 0x125   : > { %v1007_v26 = vsel %vm978_vm2, %v974_v25, %v873_v30  ;;  %v841_v36 = vpop.permute.xlu0 %840 }
 0x126   : > { %v991_v37 = vsel %vm978_vm2, %v958_v35, %v841_v36  ;;  %1757 = vmatprep.mubr.msk.f32.mxu1 %vm1013_vm3, %v1007_v26 }
 0x127   : > { %1733 = vmatprep.mubr.msk.f32.mxu0 %vm1013_vm3, %v991_v37 }
 0x128   : > { %v875_v43 = vpop.permute.xlu1 %874 }
 0x129   : > { %v1008_v45 = vsel %vm978_vm2, %v975_v54, %v875_v43  ;;  %v843_v46 = vpop.permute.xlu0 %842 }
 0x12a   : > { %v992_v48 = vsel %vm978_vm2, %v959_v44, %v843_v46  ;;  %1758 = vmatmul.mubr.msk.f32.gmra.mrb[12].mxu1 %vm1013_vm3, %v1008_v45 }
 0x12b   : > { %1734 = vmatmul.mubr.msk.f32.gmra.mrb[12].mxu0 %vm1013_vm3, %v992_v48 }
 0x12c   : > { %v651_v61 = vpop.permute.xlu1 %650 }
 0x12d   : > { %v619_v49 = vpop.permute.xlu0 %618 }
 0x12e   : > { %v927_v15 = vsel %vm912_vm0, %v2149_v50, %v619_v49  ;;  %v943_v50 = vsel %vm912_vm0, %v2146_v47, %v651_v61  ;;  %v2330_v47 = vld [vmem:[%s2485_s5] ss:$0 sm:$0xff] }
 0x130   : > { %v653_v51 = vpop.permute.xlu1 %652 }
 0x131   : > { %v621_v31 = vpop.permute.xlu0 %620  ;;  %v944_v63 = vsel %vm912_vm0, %v2160_v55, %v653_v51  ;;  %v2335_v55 = vld [vmem:[%s2486_s6] ss:$0 sm:$0xff] }
 0x132   : > { %v928_v58 = vsel %vm912_vm0, %v2165_v62, %v621_v31 }
 0x134   : > { %v1799_v32 = vpop.permute.xlu1 %1798 }
 0x135   : > { %v747_v10 = vpop.permute.xlu0 %746  ;;  %v1801_v3 = vunpack.i.h.bf16 %v1799_v32  ;;  %v1800_v59 = vunpack.i.l.bf16 %v1799_v32 }
 0x136   : > { %v960_v16 = vsel %vm945_vm1, %v927_v15, %v747_v10 }
 0x137   : > { %v976_v62 = vsel %vm945_vm1, %v943_v50, %v1800_v59  ;;  %v977_v0 = vsel %vm945_vm1, %v944_v63, %v1801_v3 }
 0x138   : > { %v845_v56 = vpop.permute.xlu1 %844 }
 0x139   : > { %v993_v52 = vsel %vm978_vm2, %v960_v16, %v845_v56  ;;  %v749_v57 = vpop.permute.xlu0 %748 }
 0x13a   : > { %1736 = vmatprep.mubr.msk.f32.mxu0 %vm1013_vm3, %v993_v52  ;;  %v961_v33 = vsel %vm945_vm1, %v928_v58, %v749_v57 }
 0x13c   : > { %v847_v17 = vpop.permute.xlu1 %846 }
 0x13d   : > { %v994_v18 = vsel %vm978_vm2, %v961_v33, %v847_v17  ;;  %v1804_v34 = vpop.permute.xlu0 %1803 }
 0x13e   : > { %v1806_v60 = vunpack.i.h.bf16 %v1804_v34  ;;  %v1805_v4 = vunpack.i.l.bf16 %v1804_v34  ;;  %1737 = vmatmul.mubr.msk.f32.gmra.mrb[14].mxu0 %vm1013_vm3, %v994_v18 }
 0x140   : > { %v1009_v5 = vsel %vm978_vm2, %v976_v62, %v1805_v4  ;;  %v1010_v1 = vsel %vm978_vm2, %v977_v0, %v1806_v60 }
 0x141   : > { %1760 = vmatprep.mubr.msk.f32.mxu1 %vm1013_vm3, %v1009_v5 }
 0x142   : > { %1761 = vmatmul.mubr.msk.f32.gmra.mrb[14].mxu1 %vm1013_vm3, %v1010_v1 }
 0x16d   : > { %v1741_v8 = vpop.f32.mrb[0].mxu1 }
 0x16e   : > { %v1717_v2 = vpop.f32.mrb[0].mxu0  ;;  %v1359_v9 = vmul.f32 %v1741_v8, %v2330_v47  ;;  %v1256_v11 = vpop.f32.mrb[1].mxu1 }
 0x16f   : > { %v1343_v12 = vmul.f32 %v1717_v2, %v2330_v47  ;;  %v1176_v39 = vpop.f32.mrb[1].mxu0  ;;  %v1358_v40 = vmul.f32 %v2330_v47, %v1256_v11 }
 0x170   : > { %v1398_v13 = vadd.f32 %v2335_v55, %v1359_v9  ;;  %v1342_v14 = vmul.f32 %v2330_v47, %v1176_v39 }
 0x171   : > { %v1382_v6 = vadd.f32 %v2335_v55, %v1343_v12  ;;  %v1397_v23 = vadd.f32 %v2335_v55, %v1358_v40 }
 0x172   : > { %v1430_v24 = vmax.f32 %v1398_v13, 0.0  ;;  %v1381_v41 = vadd.f32 %v2335_v55, %v1342_v14 }
 0x173   : > { %v1414_v19 = vmax.f32 %v1382_v6, 0.0  ;;  %v1429_v7 = vmax.f32 %v1397_v23, 0.0 }
 0x174   : > { %1463 = vst.msk [vmem:[%s2346_s23 + $0x88] sm:$0xff] %vm1445_vm4, %v1430_v24  ;;  %v1413_v20 = vmax.f32 %v1381_v41, 0.0 }
 0x175   : > { %1447 = vst.msk [vmem:[%s2346_s23 + $0x8] sm:$0xff] %vm1445_vm4, %v1414_v19  ;;  %1462 = vst.msk [vmem:[%s2346_s23 + $0x80] sm:$0xff] %vm1445_vm4, %v1429_v7 }
 0x176   : > { %1446 = vst.msk [vmem:[%s2346_s23] sm:$0xff] %vm1445_vm4, %v1413_v20 }
 0x185   : > { %v1744_v21 = vpop.f32.mrb[2].mxu1 }
 0x186   : > { %v1720_v42 = vpop.f32.mrb[2].mxu0  ;;  %v1361_v22 = vmul.f32 %v1744_v21, %v2330_v47  ;;  %v1266_v27 = vpop.f32.mrb[3].mxu1 }
 0x187   : > { %v1345_v28 = vmul.f32 %v1720_v42, %v2330_v47  ;;  %v1186_v29 = vpop.f32.mrb[3].mxu0  ;;  %v1360_v25 = vmul.f32 %v2330_v47, %v1266_v27 }
 0x188   : > { %v1400_v30 = vadd.f32 %v2335_v55, %v1361_v22  ;;  %v1344_v35 = vmul.f32 %v2330_v47, %v1186_v29 }
 0x189   : > { %v1384_v26 = vadd.f32 %v2335_v55, %v1345_v28  ;;  %v1399_v36 = vadd.f32 %v2335_v55, %v1360_v25 }
 0x18a   : > { %v1432_v37 = vmax.f32 %v1400_v30, 0.0  ;;  %v1383_v38 = vadd.f32 %v2335_v55, %v1344_v35 }
 0x18b   : > { %v1416_v53 = vmax.f32 %v1384_v26, 0.0  ;;  %v1431_v54 = vmax.f32 %v1399_v36, 0.0 }
 0x18c   : > { %1465 = vst.msk [vmem:[%s2346_s23 + $0x98] sm:$0xff] %vm1445_vm4, %v1432_v37  ;;  %v1415_v43 = vmax.f32 %v1383_v38, 0.0 }
 0x18d   : > { %1449 = vst.msk [vmem:[%s2346_s23 + $0x18] sm:$0xff] %vm1445_vm4, %v1416_v53  ;;  %1464 = vst.msk [vmem:[%s2346_s23 + $0x90] sm:$0xff] %vm1445_vm4, %v1431_v54 }
 0x18e   : > { %1448 = vst.msk [vmem:[%s2346_s23 + $0x10] sm:$0xff] %vm1445_vm4, %v1415_v43 }
 0x19d   : > { %v1747_v44 = vpop.f32.mrb[4].mxu1 }
 0x19e   : > { %v1723_v45 = vpop.f32.mrb[4].mxu0  ;;  %v1363_v46 = vmul.f32 %v1747_v44, %v2330_v47  ;;  %v1276_v48 = vpop.f32.mrb[5].mxu1 }
 0x19f   : > { %v1347_v61 = vmul.f32 %v1723_v45, %v2330_v47  ;;  %v1196_v49 = vpop.f32.mrb[5].mxu0  ;;  %v1362_v51 = vmul.f32 %v2330_v47, %v1276_v48 }
 0x1a0   : > { %v1402_v31 = vadd.f32 %v2335_v55, %v1363_v46  ;;  %v1346_v32 = vmul.f32 %v2330_v47, %v1196_v49 }
 0x1a1   : > { %v1386_v10 = vadd.f32 %v2335_v55, %v1347_v61  ;;  %v1401_v15 = vadd.f32 %v2335_v55, %v1362_v51 }
 0x1a2   : > { %v1434_v16 = vmax.f32 %v1402_v31, 0.0  ;;  %v1385_v56 = vadd.f32 %v2335_v55, %v1346_v32 }
 0x1a3   : > { %v1418_v52 = vmax.f32 %v1386_v10, 0.0  ;;  %v1433_v57 = vmax.f32 %v1401_v15, 0.0 }
 0x1a4   : > { %1467 = vst.msk [vmem:[%s2346_s23 + $0xa8] sm:$0xff] %vm1445_vm4, %v1434_v16  ;;  %v1417_v58 = vmax.f32 %v1385_v56, 0.0 }
 0x1a5   : > { %1451 = vst.msk [vmem:[%s2346_s23 + $0x28] sm:$0xff] %vm1445_vm4, %v1418_v52  ;;  %1466 = vst.msk [vmem:[%s2346_s23 + $0xa0] sm:$0xff] %vm1445_vm4, %v1433_v57 }
 0x1a6   : > { %1450 = vst.msk [vmem:[%s2346_s23 + $0x20] sm:$0xff] %vm1445_vm4, %v1417_v58 }
 0x1b5   : > { %v1726_v3 = vpop.f32.mrb[6].mxu0  ;;  %v1750_v59 = vpop.f32.mrb[6].mxu1 }
 0x1b6   : > { %v1349_v33 = vmul.f32 %v1726_v3, %v2330_v47  ;;  %v1365_v17 = vmul.f32 %v1750_v59, %v2330_v47  ;;  %v1206_v18 = vpop.f32.mrb[7].mxu0  ;;  %v1286_v34 = vpop.f32.mrb[7].mxu1 }
 0x1b7   : > { %v1348_v50 = vmul.f32 %v2330_v47, %v1206_v18  ;;  %v1364_v63 = vmul.f32 %v2330_v47, %v1286_v34 }
 0x1b8   : > { %v1388_v60 = vadd.f32 %v2335_v55, %v1349_v33  ;;  %v1404_v4 = vadd.f32 %v2335_v55, %v1365_v17 }
 0x1b9   : > { %v1387_v62 = vadd.f32 %v2335_v55, %v1348_v50  ;;  %v1403_v0 = vadd.f32 %v2335_v55, %v1364_v63 }
 0x1ba   : > { %v1420_v5 = vmax.f32 %v1388_v60, 0.0  ;;  %v1436_v1 = vmax.f32 %v1404_v4, 0.0 }
 0x1bb   : > { %v1419_v8 = vmax.f32 %v1387_v62, 0.0  ;;  %v1435_v2 = vmax.f32 %v1403_v0, 0.0 }
 0x1bc   : > { %1453 = vst.msk [vmem:[%s2346_s23 + $0x38] sm:$0xff] %vm1445_vm4, %v1420_v5  ;;  %1469 = vst.msk [vmem:[%s2346_s23 + $0xb8] sm:$0xff] %vm1445_vm4, %v1436_v1 }
 0x1bd   : > { %1452 = vst.msk [vmem:[%s2346_s23 + $0x30] sm:$0xff] %vm1445_vm4, %v1419_v8  ;;  %1468 = vst.msk [vmem:[%s2346_s23 + $0xb0] sm:$0xff] %vm1445_vm4, %v1435_v2 }
 0x1cd   : > { %v1729_v9 = vpop.f32.mrb[8].mxu0  ;;  %v1753_v11 = vpop.f32.mrb[8].mxu1 }
 0x1ce   : > { %v1351_v12 = vmul.f32 %v1729_v9, %v2330_v47  ;;  %v1367_v39 = vmul.f32 %v1753_v11, %v2330_v47  ;;  %v1216_v40 = vpop.f32.mrb[9].mxu0  ;;  %v1296_v13 = vpop.f32.mrb[9].mxu1 }
 0x1cf   : > { %v1350_v14 = vmul.f32 %v2330_v47, %v1216_v40  ;;  %v1366_v6 = vmul.f32 %v2330_v47, %v1296_v13 }
 0x1d0   : > { %v1390_v23 = vadd.f32 %v2335_v55, %v1351_v12  ;;  %v1406_v24 = vadd.f32 %v2335_v55, %v1367_v39 }
 0x1d1   : > { %v1389_v41 = vadd.f32 %v2335_v55, %v1350_v14  ;;  %v1405_v19 = vadd.f32 %v2335_v55, %v1366_v6 }
 0x1d2   : > { %v1422_v7 = vmax.f32 %v1390_v23, 0.0  ;;  %v1438_v20 = vmax.f32 %v1406_v24, 0.0 }
 0x1d3   : > { %v1421_v21 = vmax.f32 %v1389_v41, 0.0  ;;  %v1437_v42 = vmax.f32 %v1405_v19, 0.0 }
 0x1d4   : > { %1455 = vst.msk [vmem:[%s2346_s23 + $0x48] sm:$0xff] %vm1445_vm4, %v1422_v7  ;;  %1471 = vst.msk [vmem:[%s2346_s23 + $0xc8] sm:$0xff] %vm1445_vm4, %v1438_v20 }
 0x1d5   : > { %1454 = vst.msk [vmem:[%s2346_s23 + $0x40] sm:$0xff] %vm1445_vm4, %v1421_v21  ;;  %1470 = vst.msk [vmem:[%s2346_s23 + $0xc0] sm:$0xff] %vm1445_vm4, %v1437_v42 }
 0x1e5   : > { %v1756_v22 = vpop.f32.mrb[10].mxu1 }
 0x1e6   : > { %v1732_v27 = vpop.f32.mrb[10].mxu0  ;;  %v1369_v28 = vmul.f32 %v1756_v22, %v2330_v47  ;;  %v1306_v29 = vpop.f32.mrb[11].mxu1 }
 0x1e7   : > { %v1353_v25 = vmul.f32 %v1732_v27, %v2330_v47  ;;  %v1226_v30 = vpop.f32.mrb[11].mxu0  ;;  %v1368_v35 = vmul.f32 %v2330_v47, %v1306_v29 }
 0x1e8   : > { %v1408_v26 = vadd.f32 %v2335_v55, %v1369_v28  ;;  %v1352_v36 = vmul.f32 %v2330_v47, %v1226_v30 }
 0x1e9   : > { %v1392_v37 = vadd.f32 %v2335_v55, %v1353_v25  ;;  %v1407_v38 = vadd.f32 %v2335_v55, %v1368_v35 }
 0x1ea   : > { %v1440_v53 = vmax.f32 %v1408_v26, 0.0  ;;  %v1391_v54 = vadd.f32 %v2335_v55, %v1352_v36 }
 0x1eb   : > { %v1424_v43 = vmax.f32 %v1392_v37, 0.0  ;;  %v1439_v44 = vmax.f32 %v1407_v38, 0.0 }
 0x1ec   : > { %1473 = vst.msk [vmem:[%s2346_s23 + $0xd8] sm:$0xff] %vm1445_vm4, %v1440_v53  ;;  %v1423_v45 = vmax.f32 %v1391_v54, 0.0 }
 0x1ed   : > { %1457 = vst.msk [vmem:[%s2346_s23 + $0x58] sm:$0xff] %vm1445_vm4, %v1424_v43  ;;  %1472 = vst.msk [vmem:[%s2346_s23 + $0xd0] sm:$0xff] %vm1445_vm4, %v1439_v44 }
 0x1ee   : > { %1456 = vst.msk [vmem:[%s2346_s23 + $0x50] sm:$0xff] %vm1445_vm4, %v1423_v45 }
 0x1fd   : > { %v1759_v46 = vpop.f32.mrb[12].mxu1 }
 0x1fe   : > { %v1735_v48 = vpop.f32.mrb[12].mxu0  ;;  %v1371_v61 = vmul.f32 %v1759_v46, %v2330_v47  ;;  %v1316_v49 = vpop.f32.mrb[13].mxu1 }
 0x1ff   : > { %v1355_v51 = vmul.f32 %v1735_v48, %v2330_v47  ;;  %v1236_v31 = vpop.f32.mrb[13].mxu0  ;;  %v1370_v32 = vmul.f32 %v2330_v47, %v1316_v49 }
 0x200   : > { %v1410_v10 = vadd.f32 %v2335_v55, %v1371_v61  ;;  %v1354_v15 = vmul.f32 %v2330_v47, %v1236_v31 }
 0x201   : > { %v1394_v16 = vadd.f32 %v2335_v55, %v1355_v51  ;;  %v1409_v56 = vadd.f32 %v2335_v55, %v1370_v32 }
 0x202   : > { %v1442_v52 = vmax.f32 %v1410_v10, 0.0  ;;  %v1393_v57 = vadd.f32 %v2335_v55, %v1354_v15 }
 0x203   : > { %v1426_v58 = vmax.f32 %v1394_v16, 0.0  ;;  %v1441_v3 = vmax.f32 %v1409_v56, 0.0 }
 0x204   : > { %1475 = vst.msk [vmem:[%s2346_s23 + $0xe8] sm:$0xff] %vm1445_vm4, %v1442_v52  ;;  %v1425_v59 = vmax.f32 %v1393_v57, 0.0 }
 0x205   : > { %1459 = vst.msk [vmem:[%s2346_s23 + $0x68] sm:$0xff] %vm1445_vm4, %v1426_v58  ;;  %1474 = vst.msk [vmem:[%s2346_s23 + $0xe0] sm:$0xff] %vm1445_vm4, %v1441_v3 }
 0x206   : > { %1458 = vst.msk [vmem:[%s2346_s23 + $0x60] sm:$0xff] %vm1445_vm4, %v1425_v59 }
 0x211   : > { %v1738_v33 = vpop.f32.mrb[14].mxu0 }
 0x212   : > { %v1357_v17 = vmul.f32 %v1738_v33, %v2330_v47  ;;  %v1246_v18 = vpop.f32.mrb[15].mxu0 }
 0x213   : > { %v1356_v34 = vmul.f32 %v2330_v47, %v1246_v18 }
 0x214   : > { %v1396_v50 = vadd.f32 %v2335_v55, %v1357_v17 }
 0x215   : > { %v1395_v63 = vadd.f32 %v2335_v55, %v1356_v34  ;;  %v1762_v60 = vpop.f32.mrb[14].mxu1 }
 0x216   : > { %v1428_v4 = vmax.f32 %v1396_v50, 0.0  ;;  %v1373_v62 = vmul.f32 %v1762_v60, %v2330_v47  ;;  %v1326_v0 = vpop.f32.mrb[15].mxu1 }
 0x217   : > { %v1427_v5 = vmax.f32 %v1395_v63, 0.0  ;;  %v1372_v1 = vmul.f32 %v2330_v47, %v1326_v0 }
 0x218   : > { %1461 = vst.msk [vmem:[%s2346_s23 + $0x78] sm:$0xff] %vm1445_vm4, %v1428_v4  ;;  %v1412_v8 = vadd.f32 %v2335_v55, %v1373_v62 }
 0x219   : > { %1460 = vst.msk [vmem:[%s2346_s23 + $0x70] sm:$0xff] %vm1445_vm4, %v1427_v5  ;;  %v1411_v2 = vadd.f32 %v2335_v55, %v1372_v1 }
 0x21a   : > { %v1444_v9 = vmax.f32 %v1412_v8, 0.0 }
 0x21b   : > { %v1443_v11 = vmax.f32 %v1411_v2, 0.0 }
 0x21c   : > { %1477 = vst.msk [vmem:[%s2346_s23 + $0xf8] sm:$0xff] %vm1445_vm4, %v1444_v9 }
 0x21d   : > { %1476 = vst.msk [vmem:[%s2346_s23 + $0xf0] sm:$0xff] %vm1445_vm4, %v1443_v11 }
 0x21e PF: > { %s17_s25 = sadd.s32 1, %s1829_s25   ;;  %s2488_s24 = smov %s1825_s1 }
 0x21f   : > { %p14_p5 = scmp.ge.s32.totalorder %s17_s25, 4   ;;  %s2489_s1 = smov %s2491_s3 }
 0x221   :  { %16 = sbr.rel (!%p14_p5) target bundleno = 2 (0x2), region = 87 }

</bundles_post_ra>
